<compile_context>
chip_gen: v7x
topology: tpu7x:2x2x1
jax: 0.10.0
libtpu: 0.0.40
codegen_flags: <defaults>
</compile_context>

<pallas_src>
import functools
import math

import jax
import jax.numpy as jnp
from jax.experimental import pallas as pl
from jax.experimental.pallas import tpu as pltpu


# ----------------------------------------------------------------------------
# Kernels
# ----------------------------------------------------------------------------
def frontend_gap_kernel(x_ref, w_ref, b_ref, o_ref):
    # x_ref: (T_tile, C, H*W) bf16 ; w_ref: (C, D) bf16 ; b_ref: (1, D) f32
    x = x_ref[...].astype(jnp.float32)
    feat = jnp.mean(x, axis=-1)                                  # spatial GAP -> (T_tile, C)
    y = jnp.dot(feat.astype(jnp.bfloat16), w_ref[...],
                preferred_element_type=jnp.float32) + b_ref[...]
    o_ref[...] = jnp.maximum(y, 0.0).astype(o_ref.dtype)         # ReLU


def encoder_stack_kernel(feat_ref,
                         ln1g_ref, ln1b_ref, wqkv_ref, bqkv_ref, wo_ref, bo_ref,
                         ln2g_ref, ln2b_ref, w1_ref, b1_ref, w2_ref, b2_ref,
                         wc0_ref, wc1_ref, bc_ref, wp_ref, bp_ref,
                         o_ref, acc_ref, *, n_head, do_compress):
    """Whole transformer stack; grid = (batch, layer), layer axis 'arbitrary'.

    acc_ref (fp32 (T, D) VMEM scratch) holds the activation across layers.
    The compress Conv1d(k=2,s=2) + pre_dec Linear run in the last-layer epilogue.
    """
    layer = pl.program_id(1)
    n_layers = pl.num_programs(1)

    @pl.when(layer == 0)
    def _():
        acc_ref[...] = feat_ref[...].astype(jnp.float32)

    x = acc_ref[...]                                  # (T, D) fp32, VMEM-resident
    T, D = x.shape
    dh = D // n_head
    scale = 1.0 / math.sqrt(dh)

    def layernorm(v, g_ref, b_ref, eps=1e-5):         # fp32 statistics
        mu = jnp.mean(v, axis=-1, keepdims=True)
        var = jnp.mean(jnp.square(v - mu), axis=-1, keepdims=True)
        return (v - mu) * jax.lax.rsqrt(var + eps) * g_ref[...] + b_ref[...]

    # ---- pre-LN multi-head self attention -----------------------------------
    h = layernorm(x, ln1g_ref, ln1b_ref).astype(jnp.bfloat16)
    qkv = (jnp.dot(h, wqkv_ref[...], preferred_element_type=jnp.float32)
           + bqkv_ref[...])                           # fused QKV projection (T, 3D)

    attn = jnp.zeros((T, D), jnp.float32)
    for hd in range(n_head):                          # static unrolled head loop
        lo, hi = hd * dh, (hd + 1) * dh
        q_h = (qkv[:, lo:hi] * scale).astype(jnp.bfloat16)       # scale folded into q
        k_h = qkv[:, D + lo:D + hi].astype(jnp.bfloat16)
        v_h = qkv[:, 2 * D + lo:2 * D + hi].astype(jnp.bfloat16)
        s = jax.lax.dot_general(q_h, k_h, (((1,), (1,)), ((), ())),
                                preferred_element_type=jnp.float32)   # (T, T)
        s = s - jnp.max(s, axis=-1, keepdims=True)
        p = jnp.exp(s)
        p = p * pl.reciprocal(jnp.sum(p, axis=-1, keepdims=True), approx=True)
        ctx = jnp.dot(p.astype(jnp.bfloat16), v_h,
                      preferred_element_type=jnp.float32)             # (T, dh)
        # fold the output projection per head -> no jnp.concatenate needed
        attn = attn + jnp.dot(ctx.astype(jnp.bfloat16), wo_ref[lo:hi, :],
                              preferred_element_type=jnp.float32)
    x1 = x + attn + bo_ref[...]

    # ---- pre-LN position-wise feed forward ----------------------------------
    h2 = layernorm(x1, ln2g_ref, ln2b_ref).astype(jnp.bfloat16)
    ff = jnp.dot(h2, w1_ref[...], preferred_element_type=jnp.float32) + b1_ref[...]
    ff = jnp.maximum(ff, 0.0).astype(jnp.bfloat16)
    ff = jnp.dot(ff, w2_ref[...], preferred_element_type=jnp.float32) + b2_ref[...]
    x_out = x1 + ff
    acc_ref[...] = x_out

    # ---- last-layer epilogue: compress Conv1d(k=2,s=2) + pre_dec Linear -----
    @pl.when(layer == n_layers - 1)
    def _():
        if do_compress:
            t_half = T // 2
            xb = x_out.astype(jnp.bfloat16)
            # even/odd frame selection expressed as 0/1 matmuls (MXU-friendly,
            # avoids strided gathers / reshapes inside the kernel).
            col = jax.lax.broadcasted_iota(jnp.int32, (t_half, T), 1)
            row = jax.lax.broadcasted_iota(jnp.int32, (t_half, T), 0)
            sel_even = (col == 2 * row).astype(jnp.bfloat16)
            sel_odd = (col == 2 * row + 1).astype(jnp.bfloat16)
            x_even = jnp.dot(sel_even, xb, preferred_element_type=jnp.float32)
            x_odd = jnp.dot(sel_odd, xb, preferred_element_type=jnp.float32)
            c = (jnp.dot(x_even.astype(jnp.bfloat16), wc0_ref[...],
                         preferred_element_type=jnp.float32)
                 + jnp.dot(x_odd.astype(jnp.bfloat16), wc1_ref[...],
                           preferred_element_type=jnp.float32)
                 + bc_ref[...])
        else:
            c = x_out
        y = jnp.dot(c.astype(jnp.bfloat16), wp_ref[...],
                    preferred_element_type=jnp.float32) + bp_ref[...]
        o_ref[...] = y.astype(o_ref.dtype)


# ----------------------------------------------------------------------------
# Parameters (deterministic, synthetic).  Matmul weights bf16, norms/biases f32.
# ----------------------------------------------------------------------------
def init_params(key, *, in_channels, d_model, n_layers, ae_emb_dim):
    C, D, L, E = in_channels, d_model, n_layers, ae_emb_dim

    def nrm(k, shape, scale=0.02):
        return (scale * jax.random.normal(k, shape, jnp.float32)).astype(jnp.bfloat16)

    k = jax.random.split(key, 8)
    return dict(
        # simplified ResNet_GAP frontend: GAP + pointwise projection
        frontend_w=nrm(k[0], (C, D)),
        frontend_b=jnp.zeros((1, D), jnp.float32),
        # transformer stack, weights stacked over layers for streaming
        ln1_g=jnp.ones((L, 1, D), jnp.float32),
        ln1_b=jnp.zeros((L, 1, D), jnp.float32),
        w_qkv=nrm(k[1], (L, D, 3 * D)),
        b_qkv=jnp.zeros((L, 1, 3 * D), jnp.float32),
        w_o=nrm(k[2], (L, D, D)),
        b_o=jnp.zeros((L, 1, D), jnp.float32),
        ln2_g=jnp.ones((L, 1, D), jnp.float32),
        ln2_b=jnp.zeros((L, 1, D), jnp.float32),
        w_ff1=nrm(k[3], (L, D, 4 * D)),
        b_ff1=jnp.zeros((L, 1, 4 * D), jnp.float32),
        w_ff2=nrm(k[4], (L, 4 * D, D)),
        b_ff2=jnp.zeros((L, 1, D), jnp.float32),
        # Conv1d(D, D, k=2, s=2): w_c0 = weight[:, :, 0].T, w_c1 = weight[:, :, 1].T
        w_c0=nrm(k[5], (D, D)),
        w_c1=nrm(k[6], (D, D)),
        b_c=jnp.zeros((1, D), jnp.float32),
        # pre_dec Linear(d_model -> ae_emb_dim)
        w_pre=nrm(k[7], (D, E)),
        b_pre=jnp.zeros((1, E), jnp.float32),
    )


# ----------------------------------------------------------------------------
# Forward
# ----------------------------------------------------------------------------
def lip_encoder_forward(lip, params, *, n_head, compress_rate=4, t_tile=None):
    B, C, T, H, W = lip.shape
    D = params["w_o"].shape[-1]
    E = params["w_pre"].shape[-1]
    L = params["w_qkv"].shape[0]

    if compress_rate == 4:
        assert T % 2 == 0, "odd T not supported (Conv1d k=2 s=2 would truncate)"

    # glue: NCDHW -> (B, T, C, H*W), bf16 operands; H*W on the lane axis
    x = jnp.transpose(lip, (0, 2, 1, 3, 4)).reshape(B, T, C, H * W).astype(jnp.bfloat16)

    if t_tile is None:
        t_tile = 128 if (T % 128 == 0) else T
    assert T % t_tile == 0

    # 1) simplified ResNet_GAP frontend, grid over (batch, T-tiles)
    feat = pl.pallas_call(
        frontend_gap_kernel,
        grid=(B, T // t_tile),
        in_specs=[
            pl.BlockSpec((None, t_tile, C, H * W), lambda b, t: (b, t, 0, 0)),
            pl.BlockSpec((C, D), lambda b, t: (0, 0)),
            pl.BlockSpec((1, D), lambda b, t: (0, 0)),
        ],
        out_specs=pl.BlockSpec((None, t_tile, D), lambda b, t: (b, t, 0)),
        out_shape=jax.ShapeDtypeStruct((B, T, D), jnp.bfloat16),
        compiler_params=pltpu.CompilerParams(
            dimension_semantics=("parallel", "parallel")),
    )(x, params["frontend_w"], params["frontend_b"])

    # 2) fused transformer stack + compress + pre_dec (single pallas_call)
    def lspec(*shape):      # per-layer streamed block of an (L, ...) stacked weight
        n = len(shape)
        return pl.BlockSpec((None,) + tuple(shape),
                            lambda b, l, _n=n: (l,) + (0,) * _n)

    def fspec(*shape):      # fully-resident shared weight (fetched once, kept)
        n = len(shape)
        return pl.BlockSpec(tuple(shape), lambda b, l, _n=n: (0,) * _n)

    do_compress = (compress_rate == 4)
    out_T = T // 2 if do_compress else T

    out = pl.pallas_call(
        functools.partial(encoder_stack_kernel, n_head=n_head,
                          do_compress=do_compress),
        grid=(B, L),
        in_specs=[
            pl.BlockSpec((None, T, D), lambda b, l: (b, 0, 0)),   # feat (fetched once / batch)
            lspec(1, D), lspec(1, D),                             # ln1 gamma, beta
            lspec(D, 3 * D), lspec(1, 3 * D),                     # fused QKV proj
            lspec(D, D), lspec(1, D),                             # attention out proj
            lspec(1, D), lspec(1, D),                             # ln2 gamma, beta
            lspec(D, 4 * D), lspec(1, 4 * D),                     # FFN up
            lspec(4 * D, D), lspec(1, D),                         # FFN down
            fspec(D, D), fspec(D, D), fspec(1, D),                # compress conv taps
            fspec(D, E), fspec(1, E),                             # pre_dec
        ],
        out_specs=pl.BlockSpec((None, out_T, E), lambda b, l: (b, 0, 0)),
        out_shape=jax.ShapeDtypeStruct((B, out_T, E), jnp.float32),
        scratch_shapes=[pltpu.VMEM((T, D), jnp.float32)],          # resident activation
        compiler_params=pltpu.CompilerParams(
            dimension_semantics=("parallel", "arbitrary"),
            vmem_limit_bytes=48 * 1024 * 1024),
    )(feat,
      params["ln1_g"], params["ln1_b"], params["w_qkv"], params["b_qkv"],
      params["w_o"], params["b_o"], params["ln2_g"], params["ln2_b"],
      params["w_ff1"], params["b_ff1"], params["w_ff2"], params["b_ff2"],
      params["w_c0"], params["w_c1"], params["b_c"],
      params["w_pre"], params["b_pre"])
    return out


# ----------------------------------------------------------------------------
# Demo
# ----------------------------------------------------------------------------
if __name__ == "__main__":
    # small lip video (B, C, T, H, W); d_model / ae_emb_dim kept lane-dense (128)
    B, C, T, H, W = 2, 4, 16, 16, 16
    d_model, n_head, n_layers = 128, 4, 2
    ae_emb_dim = 128
    compress_rate = 4

    key = jax.random.PRNGKey(0)
    k_in, k_p = jax.random.split(key)
    lip = jax.random.normal(k_in, (B, C, T, H, W), jnp.float32)
    params = init_params(k_p, in_channels=C, d_model=d_model,
                         n_layers=n_layers, ae_emb_dim=ae_emb_dim)

    fwd = jax.jit(functools.partial(lip_encoder_forward, n_head=n_head,
                                    compress_rate=compress_rate, t_tile=8))
    out = jax.block_until_ready(fwd(lip, params))
    assert out.shape == (B, T // 2, ae_emb_dim), out.shape
    assert bool(jnp.all(jnp.isfinite(out)))
    print("KERNEL_OK")
</pallas_src>

<mosaic_0001>
module attributes {stable_mosaic.version = 11 : i64} {
  func.func @frontend_gap_kernel(%arg0: i32, %arg1: i32, %arg2: memref<1x8x4x256xbf16, #tpu.memory_space<vmem>>, %arg3: memref<4x128xbf16, #tpu.memory_space<vmem>>, %arg4: memref<1x128xf32, #tpu.memory_space<vmem>>, %arg5: memref<1x8x128xbf16, #tpu.memory_space<vmem>>) attributes {dimension_semantics = [#tpu.dimension_semantics<parallel>, #tpu.dimension_semantics<parallel>], iteration_bounds = array<i64: 2, 2>, scalar_prefetch = 0 : i64, scratch_operands = 0 : i64, tpu.core_type = #tpu.core_type<tc>, window_params = [{transform_indices = @transform_0, window_bounds = array<i64: 1, 8, 4, 256>}, {pipeline_mode = #tpu.pipeline_mode<synchronous>, transform_indices = @transform_1, window_bounds = array<i64: 4, 128>}, {pipeline_mode = #tpu.pipeline_mode<synchronous>, transform_indices = @transform_2, window_bounds = array<i64: 1, 128>}, {transform_indices = @transform_3, window_bounds = array<i64: 1, 8, 128>}]} {
    %c0 = arith.constant 0 : index
    %c0_0 = arith.constant 0 : index
    %c0_1 = arith.constant 0 : index
    %c0_2 = arith.constant 0 : index
    %0 = vector.load %arg2[%c0, %c0_0, %c0_1, %c0_2] : memref<1x8x4x256xbf16, #tpu.memory_space<vmem>>, vector<1x8x4x256xbf16>
    %1 = vector.shape_cast %0 : vector<1x8x4x256xbf16> to vector<8x4x256xbf16>
    %2 = arith.extf %1 : vector<8x4x256xbf16> to vector<8x4x256xf32>
    %cst = arith.constant dense<0.000000e+00> : vector<8x4xf32>
    %3 = vector.multi_reduction <add>, %2, %cst [2] : vector<8x4x256xf32> to vector<8x4xf32>
    %cst_3 = arith.constant 2.560000e+02 : f32
    %4 = vector.broadcast %cst_3 : f32 to vector<8x4xf32>
    %5 = arith.divf %3, %4 : vector<8x4xf32>
    %6 = arith.truncf %5 : vector<8x4xf32> to vector<8x4xbf16>
    %c0_4 = arith.constant 0 : index
    %c0_5 = arith.constant 0 : index
    %7 = vector.load %arg3[%c0_4, %c0_5] : memref<4x128xbf16, #tpu.memory_space<vmem>>, vector<4x128xbf16>
    %cst_6 = arith.constant dense<0.000000e+00> : vector<8x128xf32>
    %8 = tpu.matmul %6, %7, %cst_6 {dimension_numbers = #tpu.dot_dimension_numbers<[1], [0], [0], [1], [0, 0, 1, 1], [], []>} : vector<8x4xbf16>, vector<4x128xbf16>, vector<8x128xf32> -> vector<8x128xf32>
    %c0_7 = arith.constant 0 : index
    %c0_8 = arith.constant 0 : index
    %9 = vector.load %arg4[%c0_7, %c0_8] : memref<1x128xf32, #tpu.memory_space<vmem>>, vector<1x128xf32>
    %10 = vector.broadcast %9 : vector<1x128xf32> to vector<8x128xf32>
    %11 = arith.addf %8, %10 : vector<8x128xf32>
    %cst_9 = arith.constant 0.000000e+00 : f32
    %12 = vector.broadcast %cst_9 : f32 to vector<8x128xf32>
    %13 = arith.maximumf %11, %12 : vector<8x128xf32>
    %14 = arith.truncf %13 : vector<8x128xf32> to vector<8x128xbf16>
    %c0_10 = arith.constant 0 : index
    %c0_11 = arith.constant 0 : index
    %c0_12 = arith.constant 0 : index
    %15 = vector.load %arg5[%c0_10, %c0_11, %c0_12] : memref<1x8x128xbf16, #tpu.memory_space<vmem>>, vector<1x8x128xbf16>
    %16 = vector.shape_cast %15 : vector<1x8x128xbf16> to vector<8x128xbf16>
    %17 = vector.shape_cast %14 : vector<8x128xbf16> to vector<1x8x128xbf16>
    tpu.vector_store %arg5[%c0_10, %c0_11, %c0_12], %17 {strides = array<i32>} : memref<1x8x128xbf16, #tpu.memory_space<vmem>>, vector<1x8x128xbf16>,
    return
  }
  func.func @transform_0(%arg0: i32, %arg1: i32) -> (i32, i32, i32, i32) {
    %c0_i32 = arith.constant 0 : i32
    %c0_i32_0 = arith.constant 0 : i32
    %c0_i32_1 = arith.constant 0 : i32
    return %arg0, %arg1, %c0_i32, %c0_i32_0 : i32, i32, i32, i32
  }
  func.func @transform_1(%arg0: i32, %arg1: i32) -> (i32, i32) {
    %c0_i32 = arith.constant 0 : i32
    %c0_i32_0 = arith.constant 0 : i32
    %c0_i32_1 = arith.constant 0 : i32
    return %c0_i32, %c0_i32_0 : i32, i32
  }
  func.func @transform_2(%arg0: i32, %arg1: i32) -> (i32, i32) {
    %c0_i32 = arith.constant 0 : i32
    %c0_i32_0 = arith.constant 0 : i32
    %c0_i32_1 = arith.constant 0 : i32
    return %c0_i32, %c0_i32_0 : i32, i32
  }
  func.func @transform_3(%arg0: i32, %arg1: i32) -> (i32, i32, i32) {
    %c0_i32 = arith.constant 0 : i32
    %c0_i32_0 = arith.constant 0 : i32
    return %arg0, %arg1, %c0_i32 : i32, i32, i32
  }
}

module attributes {stable_mosaic.version = 11 : i64} {
  func.func @encoder_stack_kernel(%arg0: i32, %arg1: i32, %arg2: memref<1x16x128xbf16, #tpu.memory_space<vmem>>, %arg3: memref<1x1x128xf32, #tpu.memory_space<vmem>>, %arg4: memref<1x1x128xf32, #tpu.memory_space<vmem>>, %arg5: memref<1x128x384xbf16, #tpu.memory_space<vmem>>, %arg6: memref<1x1x384xf32, #tpu.memory_space<vmem>>, %arg7: memref<1x128x128xbf16, #tpu.memory_space<vmem>>, %arg8: memref<1x1x128xf32, #tpu.memory_space<vmem>>, %arg9: memref<1x1x128xf32, #tpu.memory_space<vmem>>, %arg10: memref<1x1x128xf32, #tpu.memory_space<vmem>>, %arg11: memref<1x128x512xbf16, #tpu.memory_space<vmem>>, %arg12: memref<1x1x512xf32, #tpu.memory_space<vmem>>, %arg13: memref<1x512x128xbf16, #tpu.memory_space<vmem>>, %arg14: memref<1x1x128xf32, #tpu.memory_space<vmem>>, %arg15: memref<128x128xbf16, #tpu.memory_space<vmem>>, %arg16: memref<128x128xbf16, #tpu.memory_space<vmem>>, %arg17: memref<1x128xf32, #tpu.memory_space<vmem>>, %arg18: memref<128x128xbf16, #tpu.memory_space<vmem>>, %arg19: memref<1x128xf32, #tpu.memory_space<vmem>>, %arg20: memref<1x8x128xf32, #tpu.memory_space<vmem>>, %arg21: memref<16x128xf32, #tpu.memory_space<vmem>>) attributes {dimension_semantics = [#tpu.dimension_semantics<parallel>, #tpu.dimension_semantics<arbitrary>], iteration_bounds = array<i64: 2, 2>, scalar_prefetch = 0 : i64, scratch_operands = 1 : i64, tpu.core_type = #tpu.core_type<tc>, window_params = [{transform_indices = @transform_0, window_bounds = array<i64: 1, 16, 128>}, {transform_indices = @transform_1, window_bounds = array<i64: 1, 1, 128>}, {transform_indices = @transform_2, window_bounds = array<i64: 1, 1, 128>}, {transform_indices = @transform_3, window_bounds = array<i64: 1, 128, 384>}, {transform_indices = @transform_4, window_bounds = array<i64: 1, 1, 384>}, {transform_indices = @transform_5, window_bounds = array<i64: 1, 128, 128>}, {transform_indices = @transform_6, window_bounds = array<i64: 1, 1, 128>}, {transform_indices = @transform_7, window_bounds = array<i64: 1, 1, 128>}, {transform_indices = @transform_8, window_bounds = array<i64: 1, 1, 128>}, {transform_indices = @transform_9, window_bounds = array<i64: 1, 128, 512>}, {transform_indices = @transform_10, window_bounds = array<i64: 1, 1, 512>}, {transform_indices = @transform_11, window_bounds = array<i64: 1, 512, 128>}, {transform_indices = @transform_12, window_bounds = array<i64: 1, 1, 128>}, {pipeline_mode = #tpu.pipeline_mode<synchronous>, transform_indices = @transform_13, window_bounds = array<i64: 128, 128>}, {pipeline_mode = #tpu.pipeline_mode<synchronous>, transform_indices = @transform_14, window_bounds = array<i64: 128, 128>}, {pipeline_mode = #tpu.pipeline_mode<synchronous>, transform_indices = @transform_15, window_bounds = array<i64: 1, 128>}, {pipeline_mode = #tpu.pipeline_mode<synchronous>, transform_indices = @transform_16, window_bounds = array<i64: 128, 128>}, {pipeline_mode = #tpu.pipeline_mode<synchronous>, transform_indices = @transform_17, window_bounds = array<i64: 1, 128>}, {transform_indices = @transform_18, window_bounds = array<i64: 1, 8, 128>}]} {
    %c0_i32 = arith.constant 0 : i32
    %0 = arith.cmpi eq, %arg1, %c0_i32 : i32
    %1 = arith.extui %0 : i1 to i32
    %c0_i32_0 = arith.constant 0 : i32
    %2 = arith.cmpi ne, %1, %c0_i32_0 : i32
    scf.if %2 {
      %c0_85 = arith.constant 0 : index
      %c0_86 = arith.constant 0 : index
      %c0_87 = arith.constant 0 : index
      %197 = vector.load %arg2[%c0_85, %c0_86, %c0_87] : memref<1x16x128xbf16, #tpu.memory_space<vmem>>, vector<1x16x128xbf16>
      %198 = vector.shape_cast %197 : vector<1x16x128xbf16> to vector<16x128xbf16>
      %199 = arith.extf %198 : vector<16x128xbf16> to vector<16x128xf32>
      %c0_88 = arith.constant 0 : index
      %c0_89 = arith.constant 0 : index
      %200 = vector.load %arg21[%c0_88, %c0_89] : memref<16x128xf32, #tpu.memory_space<vmem>>, vector<16x128xf32>
      tpu.vector_store %arg21[%c0_88, %c0_89], %199 {strides = array<i32>} : memref<16x128xf32, #tpu.memory_space<vmem>>, vector<16x128xf32>,
    } else {
    }
    %c0 = arith.constant 0 : index
    %c0_1 = arith.constant 0 : index
    %3 = vector.load %arg21[%c0, %c0_1] : memref<16x128xf32, #tpu.memory_space<vmem>>, vector<16x128xf32>
    %cst = arith.constant dense<0.000000e+00> : vector<16xf32>
    %4 = vector.multi_reduction <add>, %3, %cst [1] : vector<16x128xf32> to vector<16xf32>
    %5 = vector.shape_cast %4 : vector<16xf32> to vector<16x1xf32>
    %cst_2 = arith.constant 1.280000e+02 : f32
    %6 = vector.broadcast %cst_2 : f32 to vector<16x1xf32>
    %7 = arith.divf %5, %6 : vector<16x1xf32>
    %8 = vector.broadcast %7 : vector<16x1xf32> to vector<16x128xf32>
    %9 = arith.subf %3, %8 : vector<16x128xf32>
    %10 = arith.mulf %9, %9 : vector<16x128xf32>
    %cst_3 = arith.constant dense<0.000000e+00> : vector<16xf32>
    %11 = vector.multi_reduction <add>, %10, %cst_3 [1] : vector<16x128xf32> to vector<16xf32>
    %12 = vector.shape_cast %11 : vector<16xf32> to vector<16x1xf32>
    %cst_4 = arith.constant 1.280000e+02 : f32
    %13 = vector.broadcast %cst_4 : f32 to vector<16x1xf32>
    %14 = arith.divf %12, %13 : vector<16x1xf32>
    %15 = vector.broadcast %7 : vector<16x1xf32> to vector<16x128xf32>
    %16 = arith.subf %3, %15 : vector<16x128xf32>
    %cst_5 = arith.constant 9.99999974E-6 : f32
    %17 = vector.broadcast %cst_5 : f32 to vector<16x1xf32>
    %18 = arith.addf %14, %17 : vector<16x1xf32>
    %19 = math.rsqrt %18 : vector<16x1xf32>
    %20 = vector.broadcast %19 : vector<16x1xf32> to vector<16x128xf32>
    %21 = arith.mulf %16, %20 : vector<16x128xf32>
    %c0_6 = arith.constant 0 : index
    %c0_7 = arith.constant 0 : index
    %c0_8 = arith.constant 0 : index
    %22 = vector.load %arg3[%c0_6, %c0_7, %c0_8] : memref<1x1x128xf32, #tpu.memory_space<vmem>>, vector<1x1x128xf32>
    %23 = vector.shape_cast %22 : vector<1x1x128xf32> to vector<1x128xf32>
    %24 = vector.broadcast %23 : vector<1x128xf32> to vector<16x128xf32>
    %25 = arith.mulf %21, %24 : vector<16x128xf32>
    %c0_9 = arith.constant 0 : index
    %c0_10 = arith.constant 0 : index
    %c0_11 = arith.constant 0 : index
    %26 = vector.load %arg4[%c0_9, %c0_10, %c0_11] : memref<1x1x128xf32, #tpu.memory_space<vmem>>, vector<1x1x128xf32>
    %27 = vector.shape_cast %26 : vector<1x1x128xf32> to vector<1x128xf32>
    %28 = vector.broadcast %27 : vector<1x128xf32> to vector<16x128xf32>
    %29 = arith.addf %25, %28 : vector<16x128xf32>
    %30 = arith.truncf %29 : vector<16x128xf32> to vector<16x128xbf16>
    %c0_12 = arith.constant 0 : index
    %c0_13 = arith.constant 0 : index
    %c0_14 = arith.constant 0 : index
    %31 = vector.load %arg5[%c0_12, %c0_13, %c0_14] : memref<1x128x384xbf16, #tpu.memory_space<vmem>>, vector<1x128x384xbf16>
    %32 = vector.shape_cast %31 : vector<1x128x384xbf16> to vector<128x384xbf16>
    %cst_15 = arith.constant dense<0.000000e+00> : vector<16x384xf32>
    %33 = tpu.matmul %30, %32, %cst_15 {dimension_numbers = #tpu.dot_dimension_numbers<[1], [0], [0], [1], [0, 0, 1, 1], [], []>} : vector<16x128xbf16>, vector<128x384xbf16>, vector<16x384xf32> -> vector<16x384xf32>
    %c0_16 = arith.constant 0 : index
    %c0_17 = arith.constant 0 : index
    %c0_18 = arith.constant 0 : index
    %34 = vector.load %arg6[%c0_16, %c0_17, %c0_18] : memref<1x1x384xf32, #tpu.memory_space<vmem>>, vector<1x1x384xf32>
    %35 = vector.shape_cast %34 : vector<1x1x384xf32> to vector<1x384xf32>
    %36 = vector.broadcast %35 : vector<1x384xf32> to vector<16x384xf32>
    %37 = arith.addf %33, %36 : vector<16x384xf32>
    %cst_19 = arith.constant 0.000000e+00 : f32
    %38 = vector.broadcast %cst_19 : f32 to vector<16x128xf32>
    %39 = vector.extract_strided_slice %37 {offsets = [0, 0], sizes = [16, 32], strides = [1, 1]} : vector<16x384xf32> to vector<16x32xf32>
    %cst_20 = arith.constant 0.176776692 : f32
    %40 = vector.broadcast %cst_20 : f32 to vector<16x32xf32>
    %41 = arith.mulf %39, %40 : vector<16x32xf32>
    %42 = arith.truncf %41 : vector<16x32xf32> to vector<16x32xbf16>
    %43 = vector.extract_strided_slice %37 {offsets = [0, 128], sizes = [16, 32], strides = [1, 1]} : vector<16x384xf32> to vector<16x32xf32>
    %44 = arith.truncf %43 : vector<16x32xf32> to vector<16x32xbf16>
    %45 = vector.extract_strided_slice %37 {offsets = [0, 256], sizes = [16, 32], strides = [1, 1]} : vector<16x384xf32> to vector<16x32xf32>
    %46 = arith.truncf %45 : vector<16x32xf32> to vector<16x32xbf16>
    %cst_21 = arith.constant dense<0.000000e+00> : vector<16x16xf32>
    %47 = tpu.matmul %42, %44, %cst_21 {dimension_numbers = #tpu.dot_dimension_numbers<[1], [1], [0], [0], [0, 0, 1, 0], [], []>} : vector<16x32xbf16>, vector<16x32xbf16>, vector<16x16xf32> -> vector<16x16xf32>
    %cst_22 = arith.constant dense<0xFF800000> : vector<16xf32>
    %48 = vector.multi_reduction <maximumf>, %47, %cst_22 [1] : vector<16x16xf32> to vector<16xf32>
    %49 = vector.shape_cast %48 : vector<16xf32> to vector<16x1xf32>
    %50 = vector.broadcast %49 : vector<16x1xf32> to vector<16x16xf32>
    %51 = arith.subf %47, %50 : vector<16x16xf32>
    %52 = math.exp %51 : vector<16x16xf32>
    %cst_23 = arith.constant dense<0.000000e+00> : vector<16xf32>
    %53 = vector.multi_reduction <add>, %52, %cst_23 [1] : vector<16x16xf32> to vector<16xf32>
    %54 = vector.shape_cast %53 : vector<16xf32> to vector<16x1xf32>
    %55 = tpu.reciprocal %54 {approx = true} : vector<16x1xf32> -> vector<16x1xf32>
    %56 = vector.broadcast %55 : vector<16x1xf32> to vector<16x16xf32>
    %57 = arith.mulf %52, %56 : vector<16x16xf32>
    %58 = arith.truncf %57 : vector<16x16xf32> to vector<16x16xbf16>
    %cst_24 = arith.constant dense<0.000000e+00> : vector<16x32xf32>
    %59 = tpu.matmul %58, %46, %cst_24 {dimension_numbers = #tpu.dot_dimension_numbers<[1], [0], [0], [1], [0, 0, 1, 1], [], []>} : vector<16x16xbf16>, vector<16x32xbf16>, vector<16x32xf32> -> vector<16x32xf32>
    %60 = arith.truncf %59 : vector<16x32xf32> to vector<16x32xbf16>
    %c0_25 = arith.constant 0 : index
    %c0_26 = arith.constant 0 : index
    %c0_27 = arith.constant 0 : index
    %61 = vector.load %arg7[%c0_25, %c0_26, %c0_27] : memref<1x128x128xbf16, #tpu.memory_space<vmem>>, vector<1x32x128xbf16>
    %62 = vector.shape_cast %61 : vector<1x32x128xbf16> to vector<32x128xbf16>
    %cst_28 = arith.constant dense<0.000000e+00> : vector<16x128xf32>
    %63 = tpu.matmul %60, %62, %cst_28 {dimension_numbers = #tpu.dot_dimension_numbers<[1], [0], [0], [1], [0, 0, 1, 1], [], []>} : vector<16x32xbf16>, vector<32x128xbf16>, vector<16x128xf32> -> vector<16x128xf32>
    %64 = arith.addf %38, %63 : vector<16x128xf32>
    %65 = vector.extract_strided_slice %37 {offsets = [0, 32], sizes = [16, 32], strides = [1, 1]} : vector<16x384xf32> to vector<16x32xf32>
    %cst_29 = arith.constant 0.176776692 : f32
    %66 = vector.broadcast %cst_29 : f32 to vector<16x32xf32>
    %67 = arith.mulf %65, %66 : vector<16x32xf32>
    %68 = arith.truncf %67 : vector<16x32xf32> to vector<16x32xbf16>
    %69 = vector.extract_strided_slice %37 {offsets = [0, 160], sizes = [16, 32], strides = [1, 1]} : vector<16x384xf32> to vector<16x32xf32>
    %70 = arith.truncf %69 : vector<16x32xf32> to vector<16x32xbf16>
    %71 = vector.extract_strided_slice %37 {offsets = [0, 288], sizes = [16, 32], strides = [1, 1]} : vector<16x384xf32> to vector<16x32xf32>
    %72 = arith.truncf %71 : vector<16x32xf32> to vector<16x32xbf16>
    %cst_30 = arith.constant dense<0.000000e+00> : vector<16x16xf32>
    %73 = tpu.matmul %68, %70, %cst_30 {dimension_numbers = #tpu.dot_dimension_numbers<[1], [1], [0], [0], [0, 0, 1, 0], [], []>} : vector<16x32xbf16>, vector<16x32xbf16>, vector<16x16xf32> -> vector<16x16xf32>
    %cst_31 = arith.constant dense<0xFF800000> : vector<16xf32>
    %74 = vector.multi_reduction <maximumf>, %73, %cst_31 [1] : vector<16x16xf32> to vector<16xf32>
    %75 = vector.shape_cast %74 : vector<16xf32> to vector<16x1xf32>
    %76 = vector.broadcast %75 : vector<16x1xf32> to vector<16x16xf32>
    %77 = arith.subf %73, %76 : vector<16x16xf32>
    %78 = math.exp %77 : vector<16x16xf32>
    %cst_32 = arith.constant dense<0.000000e+00> : vector<16xf32>
    %79 = vector.multi_reduction <add>, %78, %cst_32 [1] : vector<16x16xf32> to vector<16xf32>
    %80 = vector.shape_cast %79 : vector<16xf32> to vector<16x1xf32>
    %81 = tpu.reciprocal %80 {approx = true} : vector<16x1xf32> -> vector<16x1xf32>
    %82 = vector.broadcast %81 : vector<16x1xf32> to vector<16x16xf32>
    %83 = arith.mulf %78, %82 : vector<16x16xf32>
    %84 = arith.truncf %83 : vector<16x16xf32> to vector<16x16xbf16>
    %cst_33 = arith.constant dense<0.000000e+00> : vector<16x32xf32>
    %85 = tpu.matmul %84, %72, %cst_33 {dimension_numbers = #tpu.dot_dimension_numbers<[1], [0], [0], [1], [0, 0, 1, 1], [], []>} : vector<16x16xbf16>, vector<16x32xbf16>, vector<16x32xf32> -> vector<16x32xf32>
    %86 = arith.truncf %85 : vector<16x32xf32> to vector<16x32xbf16>
    %c0_34 = arith.constant 0 : index
    %c32 = arith.constant 32 : index
    %c0_35 = arith.constant 0 : index
    %87 = vector.load %arg7[%c0_34, %c32, %c0_35] : memref<1x128x128xbf16, #tpu.memory_space<vmem>>, vector<1x32x128xbf16>
    %88 = vector.shape_cast %87 : vector<1x32x128xbf16> to vector<32x128xbf16>
    %cst_36 = arith.constant dense<0.000000e+00> : vector<16x128xf32>
    %89 = tpu.matmul %86, %88, %cst_36 {dimension_numbers = #tpu.dot_dimension_numbers<[1], [0], [0], [1], [0, 0, 1, 1], [], []>} : vector<16x32xbf16>, vector<32x128xbf16>, vector<16x128xf32> -> vector<16x128xf32>
    %90 = arith.addf %64, %89 : vector<16x128xf32>
    %91 = vector.extract_strided_slice %37 {offsets = [0, 64], sizes = [16, 32], strides = [1, 1]} : vector<16x384xf32> to vector<16x32xf32>
    %cst_37 = arith.constant 0.176776692 : f32
    %92 = vector.broadcast %cst_37 : f32 to vector<16x32xf32>
    %93 = arith.mulf %91, %92 : vector<16x32xf32>
    %94 = arith.truncf %93 : vector<16x32xf32> to vector<16x32xbf16>
    %95 = vector.extract_strided_slice %37 {offsets = [0, 192], sizes = [16, 32], strides = [1, 1]} : vector<16x384xf32> to vector<16x32xf32>
    %96 = arith.truncf %95 : vector<16x32xf32> to vector<16x32xbf16>
    %97 = vector.extract_strided_slice %37 {offsets = [0, 320], sizes = [16, 32], strides = [1, 1]} : vector<16x384xf32> to vector<16x32xf32>
    %98 = arith.truncf %97 : vector<16x32xf32> to vector<16x32xbf16>
    %cst_38 = arith.constant dense<0.000000e+00> : vector<16x16xf32>
    %99 = tpu.matmul %94, %96, %cst_38 {dimension_numbers = #tpu.dot_dimension_numbers<[1], [1], [0], [0], [0, 0, 1, 0], [], []>} : vector<16x32xbf16>, vector<16x32xbf16>, vector<16x16xf32> -> vector<16x16xf32>
    %cst_39 = arith.constant dense<0xFF800000> : vector<16xf32>
    %100 = vector.multi_reduction <maximumf>, %99, %cst_39 [1] : vector<16x16xf32> to vector<16xf32>
    %101 = vector.shape_cast %100 : vector<16xf32> to vector<16x1xf32>
    %102 = vector.broadcast %101 : vector<16x1xf32> to vector<16x16xf32>
    %103 = arith.subf %99, %102 : vector<16x16xf32>
    %104 = math.exp %103 : vector<16x16xf32>
    %cst_40 = arith.constant dense<0.000000e+00> : vector<16xf32>
    %105 = vector.multi_reduction <add>, %104, %cst_40 [1] : vector<16x16xf32> to vector<16xf32>
    %106 = vector.shape_cast %105 : vector<16xf32> to vector<16x1xf32>
    %107 = tpu.reciprocal %106 {approx = true} : vector<16x1xf32> -> vector<16x1xf32>
    %108 = vector.broadcast %107 : vector<16x1xf32> to vector<16x16xf32>
    %109 = arith.mulf %104, %108 : vector<16x16xf32>
    %110 = arith.truncf %109 : vector<16x16xf32> to vector<16x16xbf16>
    %cst_41 = arith.constant dense<0.000000e+00> : vector<16x32xf32>
    %111 = tpu.matmul %110, %98, %cst_41 {dimension_numbers = #tpu.dot_dimension_numbers<[1], [0], [0], [1], [0, 0, 1, 1], [], []>} : vector<16x16xbf16>, vector<16x32xbf16>, vector<16x32xf32> -> vector<16x32xf32>
    %112 = arith.truncf %111 : vector<16x32xf32> to vector<16x32xbf16>
    %c0_42 = arith.constant 0 : index
    %c64 = arith.constant 64 : index
    %c0_43 = arith.constant 0 : index
    %113 = vector.load %arg7[%c0_42, %c64, %c0_43] : memref<1x128x128xbf16, #tpu.memory_space<vmem>>, vector<1x32x128xbf16>
    %114 = vector.shape_cast %113 : vector<1x32x128xbf16> to vector<32x128xbf16>
    %cst_44 = arith.constant dense<0.000000e+00> : vector<16x128xf32>
    %115 = tpu.matmul %112, %114, %cst_44 {dimension_numbers = #tpu.dot_dimension_numbers<[1], [0], [0], [1], [0, 0, 1, 1], [], []>} : vector<16x32xbf16>, vector<32x128xbf16>, vector<16x128xf32> -> vector<16x128xf32>
    %116 = arith.addf %90, %115 : vector<16x128xf32>
    %117 = vector.extract_strided_slice %37 {offsets = [0, 96], sizes = [16, 32], strides = [1, 1]} : vector<16x384xf32> to vector<16x32xf32>
    %cst_45 = arith.constant 0.176776692 : f32
    %118 = vector.broadcast %cst_45 : f32 to vector<16x32xf32>
    %119 = arith.mulf %117, %118 : vector<16x32xf32>
    %120 = arith.truncf %119 : vector<16x32xf32> to vector<16x32xbf16>
    %121 = vector.extract_strided_slice %37 {offsets = [0, 224], sizes = [16, 32], strides = [1, 1]} : vector<16x384xf32> to vector<16x32xf32>
    %122 = arith.truncf %121 : vector<16x32xf32> to vector<16x32xbf16>
    %123 = vector.extract_strided_slice %37 {offsets = [0, 352], sizes = [16, 32], strides = [1, 1]} : vector<16x384xf32> to vector<16x32xf32>
    %124 = arith.truncf %123 : vector<16x32xf32> to vector<16x32xbf16>
    %cst_46 = arith.constant dense<0.000000e+00> : vector<16x16xf32>
    %125 = tpu.matmul %120, %122, %cst_46 {dimension_numbers = #tpu.dot_dimension_numbers<[1], [1], [0], [0], [0, 0, 1, 0], [], []>} : vector<16x32xbf16>, vector<16x32xbf16>, vector<16x16xf32> -> vector<16x16xf32>
    %cst_47 = arith.constant dense<0xFF800000> : vector<16xf32>
    %126 = vector.multi_reduction <maximumf>, %125, %cst_47 [1] : vector<16x16xf32> to vector<16xf32>
    %127 = vector.shape_cast %126 : vector<16xf32> to vector<16x1xf32>
    %128 = vector.broadcast %127 : vector<16x1xf32> to vector<16x16xf32>
    %129 = arith.subf %125, %128 : vector<16x16xf32>
    %130 = math.exp %129 : vector<16x16xf32>
    %cst_48 = arith.constant dense<0.000000e+00> : vector<16xf32>
    %131 = vector.multi_reduction <add>, %130, %cst_48 [1] : vector<16x16xf32> to vector<16xf32>
    %132 = vector.shape_cast %131 : vector<16xf32> to vector<16x1xf32>
    %133 = tpu.reciprocal %132 {approx = true} : vector<16x1xf32> -> vector<16x1xf32>
    %134 = vector.broadcast %133 : vector<16x1xf32> to vector<16x16xf32>
    %135 = arith.mulf %130, %134 : vector<16x16xf32>
    %136 = arith.truncf %135 : vector<16x16xf32> to vector<16x16xbf16>
    %cst_49 = arith.constant dense<0.000000e+00> : vector<16x32xf32>
    %137 = tpu.matmul %136, %124, %cst_49 {dimension_numbers = #tpu.dot_dimension_numbers<[1], [0], [0], [1], [0, 0, 1, 1], [], []>} : vector<16x16xbf16>, vector<16x32xbf16>, vector<16x32xf32> -> vector<16x32xf32>
    %138 = arith.truncf %137 : vector<16x32xf32> to vector<16x32xbf16>
    %c0_50 = arith.constant 0 : index
    %c96 = arith.constant 96 : index
    %c0_51 = arith.constant 0 : index
    %139 = vector.load %arg7[%c0_50, %c96, %c0_51] : memref<1x128x128xbf16, #tpu.memory_space<vmem>>, vector<1x32x128xbf16>
    %140 = vector.shape_cast %139 : vector<1x32x128xbf16> to vector<32x128xbf16>
    %cst_52 = arith.constant dense<0.000000e+00> : vector<16x128xf32>
    %141 = tpu.matmul %138, %140, %cst_52 {dimension_numbers = #tpu.dot_dimension_numbers<[1], [0], [0], [1], [0, 0, 1, 1], [], []>} : vector<16x32xbf16>, vector<32x128xbf16>, vector<16x128xf32> -> vector<16x128xf32>
    %142 = arith.addf %116, %141 : vector<16x128xf32>
    %143 = arith.addf %3, %142 : vector<16x128xf32>
    %c0_53 = arith.constant 0 : index
    %c0_54 = arith.constant 0 : index
    %c0_55 = arith.constant 0 : index
    %144 = vector.load %arg8[%c0_53, %c0_54, %c0_55] : memref<1x1x128xf32, #tpu.memory_space<vmem>>, vector<1x1x128xf32>
    %145 = vector.shape_cast %144 : vector<1x1x128xf32> to vector<1x128xf32>
    %146 = vector.broadcast %145 : vector<1x128xf32> to vector<16x128xf32>
    %147 = arith.addf %143, %146 : vector<16x128xf32>
    %cst_56 = arith.constant dense<0.000000e+00> : vector<16xf32>
    %148 = vector.multi_reduction <add>, %147, %cst_56 [1] : vector<16x128xf32> to vector<16xf32>
    %149 = vector.shape_cast %148 : vector<16xf32> to vector<16x1xf32>
    %cst_57 = arith.constant 1.280000e+02 : f32
    %150 = vector.broadcast %cst_57 : f32 to vector<16x1xf32>
    %151 = arith.divf %149, %150 : vector<16x1xf32>
    %152 = vector.broadcast %151 : vector<16x1xf32> to vector<16x128xf32>
    %153 = arith.subf %147, %152 : vector<16x128xf32>
    %154 = arith.mulf %153, %153 : vector<16x128xf32>
    %cst_58 = arith.constant dense<0.000000e+00> : vector<16xf32>
    %155 = vector.multi_reduction <add>, %154, %cst_58 [1] : vector<16x128xf32> to vector<16xf32>
    %156 = vector.shape_cast %155 : vector<16xf32> to vector<16x1xf32>
    %cst_59 = arith.constant 1.280000e+02 : f32
    %157 = vector.broadcast %cst_59 : f32 to vector<16x1xf32>
    %158 = arith.divf %156, %157 : vector<16x1xf32>
    %159 = vector.broadcast %151 : vector<16x1xf32> to vector<16x128xf32>
    %160 = arith.subf %147, %159 : vector<16x128xf32>
    %cst_60 = arith.constant 9.99999974E-6 : f32
    %161 = vector.broadcast %cst_60 : f32 to vector<16x1xf32>
    %162 = arith.addf %158, %161 : vector<16x1xf32>
    %163 = math.rsqrt %162 : vector<16x1xf32>
    %164 = vector.broadcast %163 : vector<16x1xf32> to vector<16x128xf32>
    %165 = arith.mulf %160, %164 : vector<16x128xf32>
    %c0_61 = arith.constant 0 : index
    %c0_62 = arith.constant 0 : index
    %c0_63 = arith.constant 0 : index
    %166 = vector.load %arg9[%c0_61, %c0_62, %c0_63] : memref<1x1x128xf32, #tpu.memory_space<vmem>>, vector<1x1x128xf32>
    %167 = vector.shape_cast %166 : vector<1x1x128xf32> to vector<1x128xf32>
    %168 = vector.broadcast %167 : vector<1x128xf32> to vector<16x128xf32>
    %169 = arith.mulf %165, %168 : vector<16x128xf32>
    %c0_64 = arith.constant 0 : index
    %c0_65 = arith.constant 0 : index
    %c0_66 = arith.constant 0 : index
    %170 = vector.load %arg10[%c0_64, %c0_65, %c0_66] : memref<1x1x128xf32, #tpu.memory_space<vmem>>, vector<1x1x128xf32>
    %171 = vector.shape_cast %170 : vector<1x1x128xf32> to vector<1x128xf32>
    %172 = vector.broadcast %171 : vector<1x128xf32> to vector<16x128xf32>
    %173 = arith.addf %169, %172 : vector<16x128xf32>
    %174 = arith.truncf %173 : vector<16x128xf32> to vector<16x128xbf16>
    %c0_67 = arith.constant 0 : index
    %c0_68 = arith.constant 0 : index
    %c0_69 = arith.constant 0 : index
    %175 = vector.load %arg11[%c0_67, %c0_68, %c0_69] : memref<1x128x512xbf16, #tpu.memory_space<vmem>>, vector<1x128x512xbf16>
    %176 = vector.shape_cast %175 : vector<1x128x512xbf16> to vector<128x512xbf16>
    %cst_70 = arith.constant dense<0.000000e+00> : vector<16x512xf32>
    %177 = tpu.matmul %174, %176, %cst_70 {dimension_numbers = #tpu.dot_dimension_numbers<[1], [0], [0], [1], [0, 0, 1, 1], [], []>} : vector<16x128xbf16>, vector<128x512xbf16>, vector<16x512xf32> -> vector<16x512xf32>
    %c0_71 = arith.constant 0 : index
    %c0_72 = arith.constant 0 : index
    %c0_73 = arith.constant 0 : index
    %178 = vector.load %arg12[%c0_71, %c0_72, %c0_73] : memref<1x1x512xf32, #tpu.memory_space<vmem>>, vector<1x1x512xf32>
    %179 = vector.shape_cast %178 : vector<1x1x512xf32> to vector<1x512xf32>
    %180 = vector.broadcast %179 : vector<1x512xf32> to vector<16x512xf32>
    %181 = arith.addf %177, %180 : vector<16x512xf32>
    %cst_74 = arith.constant 0.000000e+00 : f32
    %182 = vector.broadcast %cst_74 : f32 to vector<16x512xf32>
    %183 = arith.maximumf %181, %182 : vector<16x512xf32>
    %184 = arith.truncf %183 : vector<16x512xf32> to vector<16x512xbf16>
    %c0_75 = arith.constant 0 : index
    %c0_76 = arith.constant 0 : index
    %c0_77 = arith.constant 0 : index
    %185 = vector.load %arg13[%c0_75, %c0_76, %c0_77] : memref<1x512x128xbf16, #tpu.memory_space<vmem>>, vector<1x512x128xbf16>
    %186 = vector.shape_cast %185 : vector<1x512x128xbf16> to vector<512x128xbf16>
    %cst_78 = arith.constant dense<0.000000e+00> : vector<16x128xf32>
    %187 = tpu.matmul %184, %186, %cst_78 {dimension_numbers = #tpu.dot_dimension_numbers<[1], [0], [0], [1], [0, 0, 1, 1], [], []>} : vector<16x512xbf16>, vector<512x128xbf16>, vector<16x128xf32> -> vector<16x128xf32>
    %c0_79 = arith.constant 0 : index
    %c0_80 = arith.constant 0 : index
    %c0_81 = arith.constant 0 : index
    %188 = vector.load %arg14[%c0_79, %c0_80, %c0_81] : memref<1x1x128xf32, #tpu.memory_space<vmem>>, vector<1x1x128xf32>
    %189 = vector.shape_cast %188 : vector<1x1x128xf32> to vector<1x128xf32>
    %190 = vector.broadcast %189 : vector<1x128xf32> to vector<16x128xf32>
    %191 = arith.addf %187, %190 : vector<16x128xf32>
    %192 = arith.addf %147, %191 : vector<16x128xf32>
    %c0_82 = arith.constant 0 : index
    %c0_83 = arith.constant 0 : index
    %193 = vector.load %arg21[%c0_82, %c0_83] : memref<16x128xf32, #tpu.memory_space<vmem>>, vector<16x128xf32>
    tpu.vector_store %arg21[%c0_82, %c0_83], %192 {strides = array<i32>} : memref<16x128xf32, #tpu.memory_space<vmem>>, vector<16x128xf32>,
    %c1_i32 = arith.constant 1 : i32
    %194 = arith.cmpi eq, %arg1, %c1_i32 : i32
    %195 = arith.extui %194 : i1 to i32
    %c0_i32_84 = arith.constant 0 : i32
    %196 = arith.cmpi ne, %195, %c0_i32_84 : i32
    scf.if %196 {
      %197 = arith.truncf %192 : vector<16x128xf32> to vector<16x128xbf16>
      %198 = tpu.iota {dimensions = array<i32: 1>} : vector<8x16xi32>
      %199 = tpu.iota {dimensions = array<i32: 0>} : vector<8x16xi32>
      %c2_i32 = arith.constant 2 : i32
      %200 = vector.broadcast %c2_i32 : i32 to vector<8x16xi32>
      %201 = arith.muli %200, %199 : vector<8x16xi32>
      %202 = arith.cmpi eq, %198, %201 : vector<8x16xi32>
      %203 = arith.extui %202 : vector<8x16xi1> to vector<8x16xi32>
      %204 = arith.sitofp %203 : vector<8x16xi32> to vector<8x16xf32>
      %205 = arith.truncf %204 : vector<8x16xf32> to vector<8x16xbf16>
      %c2_i32_85 = arith.constant 2 : i32
      %206 = vector.broadcast %c2_i32_85 : i32 to vector<8x16xi32>
      %207 = arith.muli %206, %199 : vector<8x16xi32>
      %c1_i32_86 = arith.constant 1 : i32
      %208 = vector.broadcast %c1_i32_86 : i32 to vector<8x16xi32>
      %209 = arith.addi %207, %208 : vector<8x16xi32>
      %210 = arith.cmpi eq, %198, %209 : vector<8x16xi32>
      %211 = arith.extui %210 : vector<8x16xi1> to vector<8x16xi32>
      %212 = arith.sitofp %211 : vector<8x16xi32> to vector<8x16xf32>
      %213 = arith.truncf %212 : vector<8x16xf32> to vector<8x16xbf16>
      %cst_87 = arith.constant dense<0.000000e+00> : vector<8x128xf32>
      %214 = tpu.matmul %205, %197, %cst_87 {dimension_numbers = #tpu.dot_dimension_numbers<[1], [0], [0], [1], [0, 0, 1, 1], [], []>} : vector<8x16xbf16>, vector<16x128xbf16>, vector<8x128xf32> -> vector<8x128xf32>
      %cst_88 = arith.constant dense<0.000000e+00> : vector<8x128xf32>
      %215 = tpu.matmul %213, %197, %cst_88 {dimension_numbers = #tpu.dot_dimension_numbers<[1], [0], [0], [1], [0, 0, 1, 1], [], []>} : vector<8x16xbf16>, vector<16x128xbf16>, vector<8x128xf32> -> vector<8x128xf32>
      %216 = arith.truncf %214 : vector<8x128xf32> to vector<8x128xbf16>
      %c0_89 = arith.constant 0 : index
      %c0_90 = arith.constant 0 : index
      %217 = vector.load %arg15[%c0_89, %c0_90] : memref<128x128xbf16, #tpu.memory_space<vmem>>, vector<128x128xbf16>
      %cst_91 = arith.constant dense<0.000000e+00> : vector<8x128xf32>
      %218 = tpu.matmul %216, %217, %cst_91 {dimension_numbers = #tpu.dot_dimension_numbers<[1], [0], [0], [1], [0, 0, 1, 1], [], []>} : vector<8x128xbf16>, vector<128x128xbf16>, vector<8x128xf32> -> vector<8x128xf32>
      %219 = arith.truncf %215 : vector<8x128xf32> to vector<8x128xbf16>
      %c0_92 = arith.constant 0 : index
      %c0_93 = arith.constant 0 : index
      %220 = vector.load %arg16[%c0_92, %c0_93] : memref<128x128xbf16, #tpu.memory_space<vmem>>, vector<128x128xbf16>
      %cst_94 = arith.constant dense<0.000000e+00> : vector<8x128xf32>
      %221 = tpu.matmul %219, %220, %cst_94 {dimension_numbers = #tpu.dot_dimension_numbers<[1], [0], [0], [1], [0, 0, 1, 1], [], []>} : vector<8x128xbf16>, vector<128x128xbf16>, vector<8x128xf32> -> vector<8x128xf32>
      %222 = arith.addf %218, %221 : vector<8x128xf32>
      %c0_95 = arith.constant 0 : index
      %c0_96 = arith.constant 0 : index
      %223 = vector.load %arg17[%c0_95, %c0_96] : memref<1x128xf32, #tpu.memory_space<vmem>>, vector<1x128xf32>
      %224 = vector.broadcast %223 : vector<1x128xf32> to vector<8x128xf32>
      %225 = arith.addf %222, %224 : vector<8x128xf32>
      %226 = arith.truncf %225 : vector<8x128xf32> to vector<8x128xbf16>
      %c0_97 = arith.constant 0 : index
      %c0_98 = arith.constant 0 : index
      %227 = vector.load %arg18[%c0_97, %c0_98] : memref<128x128xbf16, #tpu.memory_space<vmem>>, vector<128x128xbf16>
      %cst_99 = arith.constant dense<0.000000e+00> : vector<8x128xf32>
      %228 = tpu.matmul %226, %227, %cst_99 {dimension_numbers = #tpu.dot_dimension_numbers<[1], [0], [0], [1], [0, 0, 1, 1], [], []>} : vector<8x128xbf16>, vector<128x128xbf16>, vector<8x128xf32> -> vector<8x128xf32>
      %c0_100 = arith.constant 0 : index
      %c0_101 = arith.constant 0 : index
      %229 = vector.load %arg19[%c0_100, %c0_101] : memref<1x128xf32, #tpu.memory_space<vmem>>, vector<1x128xf32>
      %230 = vector.broadcast %229 : vector<1x128xf32> to vector<8x128xf32>
      %231 = arith.addf %228, %230 : vector<8x128xf32>
      %c0_102 = arith.constant 0 : index
      %c0_103 = arith.constant 0 : index
      %c0_104 = arith.constant 0 : index
      %232 = vector.load %arg20[%c0_102, %c0_103, %c0_104] : memref<1x8x128xf32, #tpu.memory_space<vmem>>, vector<1x8x128xf32>
      %233 = vector.shape_cast %232 : vector<1x8x128xf32> to vector<8x128xf32>
      %234 = vector.shape_cast %231 : vector<8x128xf32> to vector<1x8x128xf32>
      tpu.vector_store %arg20[%c0_102, %c0_103, %c0_104], %234 {strides = array<i32>} : memref<1x8x128xf32, #tpu.memory_space<vmem>>, vector<1x8x128xf32>,
    } else {
    }
    return
  }
  func.func @transform_0(%arg0: i32, %arg1: i32) -> (i32, i32, i32) {
    %c0_i32 = arith.constant 0 : i32
    %c0_i32_0 = arith.constant 0 : i32
    %c0_i32_1 = arith.constant 0 : i32
    return %arg0, %c0_i32, %c0_i32_0 : i32, i32, i32
  }
  func.func @transform_1(%arg0: i32, %arg1: i32) -> (i32, i32, i32) {
    %c0_i32 = arith.constant 0 : i32
    %c0_i32_0 = arith.constant 0 : i32
    %c0_i32_1 = arith.constant 0 : i32
    return %arg1, %c0_i32, %c0_i32_0 : i32, i32, i32
  }
  func.func @transform_2(%arg0: i32, %arg1: i32) -> (i32, i32, i32) {
    %c0_i32 = arith.constant 0 : i32
    %c0_i32_0 = arith.constant 0 : i32
    %c0_i32_1 = arith.constant 0 : i32
    return %arg1, %c0_i32, %c0_i32_0 : i32, i32, i32
  }
  func.func @transform_3(%arg0: i32, %arg1: i32) -> (i32, i32, i32) {
    %c0_i32 = arith.constant 0 : i32
    %c0_i32_0 = arith.constant 0 : i32
    %c0_i32_1 = arith.constant 0 : i32
    return %arg1, %c0_i32, %c0_i32_0 : i32, i32, i32
  }
  func.func @transform_4(%arg0: i32, %arg1: i32) -> (i32, i32, i32) {
    %c0_i32 = arith.constant 0 : i32
    %c0_i32_0 = arith.constant 0 : i32
    %c0_i32_1 = arith.constant 0 : i32
    return %arg1, %c0_i32, %c0_i32_0 : i32, i32, i32
  }
  func.func @transform_5(%arg0: i32, %arg1: i32) -> (i32, i32, i32) {
    %c0_i32 = arith.constant 0 : i32
    %c0_i32_0 = arith.constant 0 : i32
    %c0_i32_1 = arith.constant 0 : i32
    return %arg1, %c0_i32, %c0_i32_0 : i32, i32, i32
  }
  func.func @transform_6(%arg0: i32, %arg1: i32) -> (i32, i32, i32) {
    %c0_i32 = arith.constant 0 : i32
    %c0_i32_0 = arith.constant 0 : i32
    %c0_i32_1 = arith.constant 0 : i32
    return %arg1, %c0_i32, %c0_i32_0 : i32, i32, i32
  }
  func.func @transform_7(%arg0: i32, %arg1: i32) -> (i32, i32, i32) {
    %c0_i32 = arith.constant 0 : i32
    %c0_i32_0 = arith.constant 0 : i32
    %c0_i32_1 = arith.constant 0 : i32
    return %arg1, %c0_i32, %c0_i32_0 : i32, i32, i32
  }
  func.func @transform_8(%arg0: i32, %arg1: i32) -> (i32, i32, i32) {
    %c0_i32 = arith.constant 0 : i32
    %c0_i32_0 = arith.constant 0 : i32
    %c0_i32_1 = arith.constant 0 : i32
    return %arg1, %c0_i32, %c0_i32_0 : i32, i32, i32
  }
  func.func @transform_9(%arg0: i32, %arg1: i32) -> (i32, i32, i32) {
    %c0_i32 = arith.constant 0 : i32
    %c0_i32_0 = arith.constant 0 : i32
    %c0_i32_1 = arith.constant 0 : i32
    return %arg1, %c0_i32, %c0_i32_0 : i32, i32, i32
  }
  func.func @transform_10(%arg0: i32, %arg1: i32) -> (i32, i32, i32) {
    %c0_i32 = arith.constant 0 : i32
    %c0_i32_0 = arith.constant 0 : i32
    %c0_i32_1 = arith.constant 0 : i32
    return %arg1, %c0_i32, %c0_i32_0 : i32, i32, i32
  }
  func.func @transform_11(%arg0: i32, %arg1: i32) -> (i32, i32, i32) {
    %c0_i32 = arith.constant 0 : i32
    %c0_i32_0 = arith.constant 0 : i32
    %c0_i32_1 = arith.constant 0 : i32
    return %arg1, %c0_i32, %c0_i32_0 : i32, i32, i32
  }
  func.func @transform_12(%arg0: i32, %arg1: i32) -> (i32, i32, i32) {
    %c0_i32 = arith.constant 0 : i32
    %c0_i32_0 = arith.constant 0 : i32
    %c0_i32_1 = arith.constant 0 : i32
    return %arg1, %c0_i32, %c0_i32_0 : i32, i32, i32
  }
  func.func @transform_13(%arg0: i32, %arg1: i32) -> (i32, i32) {
    %c0_i32 = arith.constant 0 : i32
    %c0_i32_0 = arith.constant 0 : i32
    %c0_i32_1 = arith.constant 0 : i32
    return %c0_i32, %c0_i32_0 : i32, i32
  }
  func.func @transform_14(%arg0: i32, %arg1: i32) -> (i32, i32) {
    %c0_i32 = arith.constant 0 : i32
    %c0_i32_0 = arith.constant 0 : i32
    %c0_i32_1 = arith.constant 0 : i32
    return %c0_i32, %c0_i32_0 : i32, i32
  }
  func.func @transform_15(%arg0: i32, %arg1: i32) -> (i32, i32) {
    %c0_i32 = arith.constant 0 : i32
    %c0_i32_0 = arith.constant 0 : i32
    %c0_i32_1 = arith.constant 0 : i32
    return %c0_i32, %c0_i32_0 : i32, i32
  }
  func.func @transform_16(%arg0: i32, %arg1: i32) -> (i32, i32) {
    %c0_i32 = arith.constant 0 : i32
    %c0_i32_0 = arith.constant 0 : i32
    %c0_i32_1 = arith.constant 0 : i32
    return %c0_i32, %c0_i32_0 : i32, i32
  }
  func.func @transform_17(%arg0: i32, %arg1: i32) -> (i32, i32) {
    %c0_i32 = arith.constant 0 : i32
    %c0_i32_0 = arith.constant 0 : i32
    %c0_i32_1 = arith.constant 0 : i32
    return %c0_i32, %c0_i32_0 : i32, i32
  }
  func.func @transform_18(%arg0: i32, %arg1: i32) -> (i32, i32, i32) {
    %c0_i32 = arith.constant 0 : i32
    %c0_i32_0 = arith.constant 0 : i32
    %c0_i32_1 = arith.constant 0 : i32
    return %arg0, %c0_i32, %c0_i32_0 : i32, i32, i32
  }
}

</mosaic_0001>

<bundles_post_ra>
// kernel: lip_encoder_forward.2
= control target key start
LH: loop header
LB: loop body
LE: loop exit
PB: predicated region body
PF: predicated region fallthrough
CT: control target
= control target key end

     0   :  { %s668_s12 = smov 0   ;;  %s670_s13 = smov 0   ;;  %s750_s0 = inlined_call_operand.vmem [shape: bf16[2,16,4,256], index: 0, kind: input, shape index: {}]   ;;  %s751_s1 = inlined_call_operand.vmem [shape: bf16[4,128], index: 1, kind: input, shape index: {}]   ;;  %s752_s2 = inlined_call_operand.vmem [shape: f32[1,128], index: 2, kind: input, shape index: {}]   ;;  %s753_s3 = inlined_call_operand.vmem [shape: bf16[2,16,128], index: 3, kind: output, shape index: {}]  }
   0x1   :  { %s672_s14 = smov 0   ;;  %s674_s15 = smov 0  }
   0x2   :  { %s676_s16 = smov 0  }
   0x3 LB: > { %s22_s17 = sadd.s32 1, %s636_s14  ;;  %s25_s18 = sadd.s32 1, %s640_s15  ;;  %s644_s16 = sphi %s676_s16, %s13_s16   ;;  %s640_s15 = sphi %s674_s15, %s757_s15   ;;  %s636_s14 = sphi %s672_s14, %s756_s14   ;;  %s632_s13 = sphi %s670_s13, %s755_s13   ;;  %s628_s12 = sphi %s668_s12, %s754_s12  }
   0x4   : > { %p23_p0 = scmp.ge.s32.totalorder %s22_s17, 2  ;;  %p526_p1 = scmp.ge.s32.totalorder %s644_s16, 1 }
   0x5   : > { %p159_p2 = scmp.lt.s32.totalorder %s644_s16, 5 }
   0x6   : > { %s759_s17 = smov (%p23_p0, %s22_s17), 0  ;;  %s761_s18 = smov (!%p23_p0, %s25_s18), %s640_s15 }
   0x7   : > { %p160_p3 = pnand %p526_p1, %p159_p2  ;;  %p27_p4 = scmp.ge.s32.totalorder %s761_s18, 2 }
   0x8   : > { %s527_s19 = sshll.u32 (!%p160_p3), %s628_s12, 3  ;;  %p192_p5 = scmp.lt.s32.totalorder (!%p160_p3), %s632_s13, 1  ;;  %vm251_vm0 = vcmask (!%p160_p3), 1043456   ;;  %v309_v44 = vld [vmem:[%s751_s1] sm:$0x3] (!%p160_p3)  ;;  %vm386_vm1 = vcmask (!%p160_p3), 1041408   ;;  %v333_v47 = vlaneseq (!%p160_p3) }
   0x9   : > { %s763_s18 = smov (%p27_p4, %s761_s18), 0  ;;  %163 = sbr.rel (%p160_p3) target bundleno = 414 (0x19e), region = 32 }
   0xa   : > { %p194_p6 = scmp.lt.s32.totalorder (!%p160_p3), %s527_s19, 15  ;;  %v646_v45 = vmov (!%p160_p3), 0.0   ;;  %v388_v46 = vsel (!%p160_p3), %vm386_vm1, %v309_v44, 0  ;;  %vm647_vm2 = vmmov (!%p160_p3), 0   ;;  %v334_v52 = vand.u32 (!%p160_p3), 127, %v333_v47  ;;  %p204_p7 = scmp.lt.s32.totalorder (!%p160_p3), %s628_s12, 1 }
   0xb   : > { %558 = vmatprep.subr.bf16.mxu0 (!%p160_p3), %v646_v45  ;;  %560 = vmatprep.mubr.msk.bf16.mxu0 (!%p160_p3), %vm647_vm2, %v646_v45  ;;  %v336_v53 = vshrl.u32 (!%p160_p3), %v333_v47, 7  ;;  %vm367_vm3 = vcmask (!%p160_p3), 1041409   ;;  %vm369_vm4 = vcmask (!%p160_p3), 1042434   ;;  %vm371_vm5 = vcmask (!%p160_p3), 1043459  }
   0xc   : > { %559 = vmatpush3.bf16.msra.mxu0 (!%p160_p3), %v388_v46  ;;  %vm373_vm6 = vcmask (!%p160_p3), 1044484   ;;  %vm375_vm7 = vcmask (!%p160_p3), 1045509   ;;  %vm377_vm8 = vcmask (!%p160_p3), 1046534   ;;  %vm379_vm9 = vcmask (!%p160_p3), 1047559  }
   0xd   : > { %v337_v60 = vsub.s32 (!%p160_p3), %v334_v52, %v336_v53  ;;  %vm382_vm10 = vcmask (!%p160_p3), 31744  }
  0x10   : > { %s765_s13 = smov (!%p192_p5, %s632_s13), 1  ;;  %s767_s19 = smov (!%p194_p6, %s527_s19), 15 }
  0x11   : > { %s529_s20 = sshll.u32 %s765_s13, 5  ;;  %s528_s21 = sshll.u32 %s767_s19, 1 }
  0x12   : > { %s198_s22 = sadd.s32 %s529_s20, %s528_s21  ;;  %s769_s12 = smov (!%p204_p7, %s628_s12), 1 }
  0x13   : > { %s530_s23 = sshll.u32 %s198_s22, 1  ;;  %s531_s29 = sshll.u32 %s765_s13, 1 }
  0x14   : > { %s200_s26 = scalar_lea.vmem %s750_s0, %s530_s23  ;;  %s207_s30 = sadd.s32 %s531_s29, %s769_s12 }
  0x15   : > { %v538_v0 = vld [vmem:[%s200_s26] sm:$0xff]   ;;  %v553_v1 = vld [vmem:[%s200_s26 + $0x8] sm:$0xff]   ;;  %v554_v2 = vld [vmem:[%s200_s26 + $0x10] sm:$0xff]   ;;  %s532_s6 = sshll.u32 %s207_s30, 2 }
  0x16   : > { %v539_v3 = vunpack.c.l.bf16 %v538_v0  ;;  %v543_v4 = vunpack.c.l.bf16 %v553_v1  ;;  %v540_v5 = vunpack.c.h.bf16 %v538_v0  ;;  %v544_v6 = vunpack.c.h.bf16 %v553_v1  ;;  %v555_v7 = vld [vmem:[%s200_s26 + $0x18] sm:$0xff]   ;;  %s209_s9 = scalar_lea.vmem %s753_s3, %s532_s6 }
  0x17   : > { %v547_v8 = vunpack.c.l.bf16 %v554_v2  ;;  %v548_v9 = vunpack.c.h.bf16 %v554_v2  ;;  %v551_v10 = vunpack.c.l.bf16 %v555_v7  ;;  %v552_v18 = vunpack.c.h.bf16 %v555_v7 }
  0x18   : > { %v235_v11 = vcombine.high %v539_v3, %v539_v3  ;;  %v252_v12 = vsel %vm251_vm0, %v539_v3, 0.0  ;;  %v237_v13 = vcombine.high %v543_v4, %v543_v4  ;;  %v262_v14 = vsel %vm251_vm0, %v543_v4, 0.0 }
  0x19   : > { %v236_v15 = vcombine.high %v540_v5, %v540_v5  ;;  %v257_v16 = vsel %vm251_vm0, %v540_v5, 0.0  ;;  %v238_v17 = vcombine.high %v544_v6, %v544_v6  ;;  %v267_v21 = vsel %vm251_vm0, %v544_v6, 0.0 }
  0x1a   : > { %v253_v19 = vsel %vm251_vm0, %v235_v11, 0.0  ;;  %v263_v20 = vsel %vm251_vm0, %v237_v13, 0.0  ;;  %v239_v22 = vcombine.high %v547_v8, %v547_v8  ;;  %v240_v27 = vcombine.high %v548_v9, %v548_v9 }
  0x1b   : > { %v254_v23 = vadd.f32 %v253_v19, %v252_v12  ;;  %v264_v24 = vadd.f32 %v263_v20, %v262_v14  ;;  %v258_v25 = vsel %vm251_vm0, %v236_v15, 0.0  ;;  %v268_v26 = vsel %vm251_vm0, %v238_v17, 0.0 }
  0x1c   : > { %v259_v28 = vadd.f32 %v258_v25, %v257_v16  ;;  %v269_v29 = vadd.f32 %v268_v26, %v267_v21  ;;  %v272_v30 = vsel %vm251_vm0, %v547_v8, 0.0  ;;  %v273_v31 = vsel %vm251_vm0, %v239_v22, 0.0 }
  0x1d   : > { %255 = vadd.xlane.f32.xlu0 %v254_v23  ;;  %265 = vadd.xlane.f32.xlu1 %v264_v24  ;;  %v277_v32 = vsel %vm251_vm0, %v548_v9, 0.0  ;;  %v278_v33 = vsel %vm251_vm0, %v240_v27, 0.0  ;;  %v241_v34 = vcombine.high %v551_v10, %v551_v10  ;;  %v242_v35 = vcombine.high %v552_v18, %v552_v18 }
  0x1e   : > { %v274_v36 = vadd.f32 %v273_v31, %v272_v30  ;;  %v279_v37 = vadd.f32 %v278_v33, %v277_v32  ;;  %v282_v38 = vsel %vm251_vm0, %v551_v10, 0.0  ;;  %v287_v40 = vsel %vm251_vm0, %v552_v18, 0.0 }
  0x1f   : > { %v283_v39 = vsel %vm251_vm0, %v241_v34, 0.0  ;;  %v288_v41 = vsel %vm251_vm0, %v242_v35, 0.0  ;;  %v533_v35 = vld [vmem:[%s752_s2] ss:$0 sm:$0xff] }
  0x20   : > { %v284_v42 = vadd.f32 %v283_v39, %v282_v38  ;;  %v289_v43 = vadd.f32 %v288_v41, %v287_v40 }
  0x21   : > { %260 = vadd.xlane.f32.xlu0 %v259_v28  ;;  %270 = vadd.xlane.f32.xlu1 %v269_v29 }
  0x25   : > { %275 = vadd.xlane.f32.xlu0 %v274_v36  ;;  %280 = vadd.xlane.f32.xlu1 %v279_v37 }
  0x29   : > { %285 = vadd.xlane.f32.xlu0 %v284_v42  ;;  %290 = vadd.xlane.f32.xlu1 %v289_v43 }
  0xaa   : > { %v256_v48 = vpop.xlane.xlu0 %255  ;;  %v266_v49 = vpop.xlane.xlu1 %265 }
  0xab   : > { %v293_v50 = vmul.f32 0.00390625, %v256_v48  ;;  %v295_v51 = vmul.f32 0.00390625, %v266_v49 }
  0xad   : > { %v301_v54 = vpack.c.bf16 %v293_v50, %v293_v50  ;;  %v303_v55 = vpack.c.bf16 %v295_v51, %v295_v51 }
  0xae   : > { %v261_v56 = vpop.xlane.xlu0 %260  ;;  %v271_v57 = vpop.xlane.xlu1 %270 }
  0xaf   : > { %v294_v58 = vmul.f32 0.00390625, %v261_v56  ;;  %v296_v59 = vmul.f32 0.00390625, %v271_v57  ;;  %v325_v61 = vunpack.c.l.b16 %v301_v54  ;;  %v327_v0 = vunpack.c.l.b16 %v303_v55 }
  0xb1   : > { %v302_v62 = vpack.c.bf16 %v294_v58, %v294_v58  ;;  %v304_v63 = vpack.c.bf16 %v296_v59, %v296_v59  ;;  %v338_v7 = vrot.slane %v325_v61, %v337_v60  ;;  %v346_v12 = vrot.slane %v327_v0, %v337_v60 }
  0xb2   : > { %v276_v1 = vpop.xlane.xlu0 %275  ;;  %v281_v2 = vpop.xlane.xlu1 %280 }
  0xb3   : > { %v326_v3 = vunpack.c.l.b16 %v302_v62  ;;  %v328_v4 = vunpack.c.l.b16 %v304_v63  ;;  %v297_v5 = vmul.f32 0.00390625, %v276_v1  ;;  %v298_v6 = vmul.f32 0.00390625, %v281_v2 }
  0xb5   : > { %v342_v8 = vrot.slane %v326_v3, %v337_v60  ;;  %v350_v9 = vrot.slane %v328_v4, %v337_v60  ;;  %v305_v10 = vpack.c.bf16 %v297_v5, %v297_v5  ;;  %v306_v11 = vpack.c.bf16 %v298_v6, %v298_v6 }
  0xb6   : > { %v286_v13 = vpop.xlane.xlu0 %285  ;;  %v291_v14 = vpop.xlane.xlu1 %290 }
  0xb7   : > { %v368_v15 = vsel %vm367_vm3, %v342_v8, %v338_v7  ;;  %v329_v16 = vunpack.c.l.b16 %v305_v10  ;;  %v330_v17 = vunpack.c.l.b16 %v306_v11  ;;  %v299_v18 = vmul.f32 0.00390625, %v286_v13 }
  0xb8   : > { %v370_v19 = vsel %vm369_vm4, %v346_v12, %v368_v15  ;;  %v300_v20 = vmul.f32 0.00390625, %v291_v14 }
  0xb9   : > { %v372_v21 = vsel %vm371_vm5, %v350_v9, %v370_v19  ;;  %v354_v22 = vrot.slane %v329_v16, %v337_v60  ;;  %v307_v23 = vpack.c.bf16 %v299_v18, %v299_v18  ;;  %v358_v24 = vrot.slane %v330_v17, %v337_v60 }
  0xba   : > { %v308_v25 = vpack.c.bf16 %v300_v20, %v300_v20 }
  0xbb   : > { %v374_v26 = vsel %vm373_vm6, %v354_v22, %v372_v21  ;;  %v331_v27 = vunpack.c.l.b16 %v307_v23 }
  0xbc   : > { %v332_v28 = vunpack.c.l.b16 %v308_v25  ;;  %v376_v30 = vsel %vm375_vm7, %v358_v24, %v374_v26 }
  0xbd   : > { %v362_v29 = vrot.slane %v331_v27, %v337_v60 }
  0xbe   : > { %v366_v31 = vrot.slane %v332_v28, %v337_v60 }
  0xbf   : > { %v378_v32 = vsel %vm377_vm8, %v362_v29, %v376_v30 }
  0xc0   : > { %v380_v33 = vsel %vm379_vm9, %v366_v31, %v378_v32 }
  0xc1   : > { %v381_v34 = vpack.c.b16 %v380_v33, %v380_v33 }
  0xc3   : > { %561 = vmatmul.mubr.msk.bf16.vlgmr.msra.gmra.mrb[0].mxu0 %vm382_vm10, %v381_v34 }
 0x196   : > { %v424_v36 = vpop.f32.mrb[0].mxu0 }
 0x197   : > { %v425_v37 = vadd.f32 %v533_v35, %v424_v36  ;;  %v562_v38 = vpop.f32.mrb[1].mxu0 }
 0x198   : > { %v427_v39 = vpop.f32.mrb[2].mxu0 }
 0x199   : > { %v430_v40 = vmax.f32 %v425_v37, 0.0  ;;  %v563_v41 = vpop.f32.mrb[3].mxu0 }
 0x19b   : > { %v431_v42 = vpack.c.bf16 %v430_v40, %v430_v40 }
 0x19d   : > { %432 = vst [vmem:[%s209_s9] sm:$0xf] %v431_v42 }
 0x19e PF: > { %s13_s16 = sadd.s32 1, %s644_s16   ;;  %s754_s12 = smov %s636_s14 }
 0x19f   : > { %p10_p8 = scmp.ge.s32.totalorder %s13_s16, 6   ;;  %s755_s13 = smov %s640_s15 }
 0x1a0   : > { %s756_s14 = smov %s759_s17  ;;  %s757_s15 = smov %s763_s18 }
 0x1a1   :  { %12 = sbr.rel (!%p10_p8) target bundleno = 3 (0x3), region = 62 }

// kernel: lip_encoder_forward.3
= control target key start
LH: loop header
LB: loop body
LE: loop exit
PB: predicated region body
PF: predicated region fallthrough
CT: control target
= control target key end

     0   :  { %s4736_s0 = inlined_call_operand.vmem [shape: bf16[2,16,128], index: 0, kind: input, shape index: {}]   ;;  %s4737_s1 = inlined_call_operand.vmem [shape: f32[2,1,128], index: 1, kind: input, shape index: {}]   ;;  %s4738_s2 = inlined_call_operand.vmem [shape: f32[2,1,128], index: 2, kind: input, shape index: {}]   ;;  %s4739_s3 = inlined_call_operand.vmem [shape: bf16[2,128,384], index: 3, kind: input, shape index: {}]   ;;  %s4740_s4 = inlined_call_operand.vmem [shape: f32[2,1,384], index: 4, kind: input, shape index: {}]   ;;  %s4741_s5 = inlined_call_operand.vmem [shape: bf16[2,128,128], index: 5, kind: input, shape index: {}]   ;;  %s4742_s6 = inlined_call_operand.vmem [shape: f32[2,1,128], index: 6, kind: input, shape index: {}]   ;;  %s4743_s7 = inlined_call_operand.vmem [shape: f32[2,1,128], index: 7, kind: input, shape index: {}]   ;;  %s4744_s8 = inlined_call_operand.vmem [shape: f32[2,1,128], index: 8, kind: input, shape index: {}]   ;;  %s4745_s9 = inlined_call_operand.vmem [shape: bf16[2,128,512], index: 9, kind: input, shape index: {}]   ;;  %s4746_s10 = inlined_call_operand.vmem [shape: f32[2,1,512], index: 10, kind: input, shape index: {}]   ;;  %s4747_s11 = inlined_call_operand.vmem [shape: bf16[2,512,128], index: 11, kind: input, shape index: {}]   ;;  %s4748_s12 = inlined_call_operand.vmem [shape: f32[2,1,128], index: 12, kind: input, shape index: {}]   ;;  %s4749_s13 = inlined_call_operand.vmem [shape: bf16[128,128], index: 13, kind: input, shape index: {}]   ;;  %s4750_s14 = inlined_call_operand.vmem [shape: bf16[128,128], index: 14, kind: input, shape index: {}]   ;;  %s4751_s15 = inlined_call_operand.vmem [shape: f32[1,128], index: 15, kind: input, shape index: {}]   ;;  %s4752_s16 = inlined_call_operand.vmem [shape: bf16[128,128], index: 16, kind: input, shape index: {}]   ;;  %s4753_s17 = inlined_call_operand.vmem [shape: f32[1,128], index: 17, kind: input, shape index: {}]   ;;  %s4754_s18 = inlined_call_operand.hbm [shape: f32[2,8,128], index: 18, kind: output, shape index: {}]  }
   0x1   :  { %4773 = sst [smem:[#allocation19_spill]] %s4736_s0 }
   0x2   :  { %4774 = sst [smem:[#allocation20_spill]] %s4737_s1 }
   0x3   :  { %4775 = sst [smem:[#allocation21_spill]] %s4738_s2 }
   0x4   :  { %4776 = sst [smem:[#allocation22_spill]] %s4739_s3 }
   0x5   :  { %4777 = sst [smem:[#allocation23_spill]] %s4749_s13 }
   0x6   :  { %4778 = sst [smem:[#allocation24_spill]] %s4750_s14 }
   0x7   :  { %4779 = sst [smem:[#allocation25_spill]] %s4751_s15 }
   0x8   :  { %4780 = sst [smem:[#allocation26_spill]] %s4752_s16 }
   0x9   :  { %4781 = sst [smem:[#allocation27_spill]] %s4753_s17 }
   0xa   :  { %4782 = sst [smem:[#allocation28_spill]] %s4754_s18 }
   0xb   :  { %23 = vsyncpa [#allocation4], 0 }
   0xc   :  { %25 = vsyncpa [#allocation4 + $0x1], 0  ;;  %s4119_s27 = smov 0   ;;  %s4121_s28 = smov 0  }
   0xd   :  { %s4123_s29 = smov 0   ;;  %s4125_s30 = smov 0  }
   0xe   :  { %s4127_s0 = smov 0   ;;  %s4129_s19 = smov 0  }
   0xf   :  { %s4131_s1 = smov 0   ;;  %s4133_s20 = smov 0  }
  0x10 LB: > { %4783 = sst [smem:[#allocation6_spill]] %s3985_s27  ;;  %s3194_s21 = sadd.s32 4294967295, %s4013_s20   ;;  %s4013_s20 = sphi %s4133_s20, %s31_s20   ;;  %s4009_s1 = sphi %s4131_s1, %s4830_s1   ;;  %s4005_s19 = sphi %s4129_s19, %s4829_s19   ;;  %s4001_s0 = sphi %s4127_s0, %s4828_s0   ;;  %s3997_s30 = sphi %s4125_s30, %s4827_s30   ;;  %s3993_s29 = sphi %s4123_s29, %s4826_s29   ;;  %s3989_s28 = sphi %s4121_s28, %s4825_s28   ;;  %s3985_s27 = sphi %s4119_s27, %s4824_s27  }
  0x11   : > { %4784 = sst [smem:[#allocation7_spill]] %s3989_s28  ;;  %s3195_s22 = sadd.s32 4294967294, %s4013_s20  }
  0x12   : > { %4785 = sst [smem:[#allocation8_spill]] %s3993_s29  ;;  %s40_s2 = sadd.s32 1, %s4005_s19 }
  0x13   : > { %4786 = sst [smem:[#allocation9_spill]] %s3997_s30  ;;  %p41_p0 = scmp.ge.s32.totalorder %s40_s2, 2 }
  0x14   : > { %4787 = sst [smem:[#allocation10_spill]] %s4001_s0  ;;  %s43_s23 = sadd.s32 1, %s4009_s1 }
  0x15   : > { %4788 = sst [smem:[#allocation11_spill]] %s4005_s19  ;;  %p503_p1 = scmp.ne.s32.totalorder %s3993_s29, %s3989_s28 }
  0x16   : > { %4789 = sst [smem:[#allocation12_spill]] %s4009_s1  ;;  %p504_p2 = scmp.eq.s32.totalorder %s3194_s21, 3 }
  0x17   : > { %4790 = sst [smem:[#allocation13_spill]] %s4013_s20  ;;  %s4832_s2 = smov (%p41_p0, %s40_s2), 0 }
  0x18   : > { %4791 = sst [smem:[#allocation14_spill]] %s4832_s2  ;;  %s4834_s23 = smov (!%p41_p0, %s43_s23), %s4009_s1 }
  0x19   : > { %p4168_p3 = por %p504_p2, %p503_p1  ;;  %p509_p4 = scmp.ne.s32.totalorder %s3989_s28, %s3985_s27 }
  0x1a   : > { %p45_p5 = scmp.ge.s32.totalorder %s4834_s23, 2  ;;  %p510_p6 = scmp.eq.s32.totalorder %s3195_s22, 3 }
  0x1b   : > { %s4792_s24 = scalar_select %p4168_p3, 1, 0 }
  0x1c   : > { %p3198_p7 = scmp.ge.s32.totalorder %s4013_s20, 1  ;;  %p633_p8 = scmp.lt.s32.totalorder %s4013_s20, 5 }
  0x1d   : > { %4793 = sst [smem:[#allocation15_spill]] %s4792_s24  ;;  %s4836_s23 = smov (%p45_p5, %s4834_s23), 0 }
  0x1e   : > { %4794 = sst [smem:[#allocation16_spill]] %s4836_s23  ;;  %p4178_p9 = por %p510_p6, %p509_p4 }
  0x1f   : > { %p634_p10 = pnand %p3198_p7, %p633_p8  ;;  %s490_s26 = ssub.s32 %s4009_s1, %s4836_s23 }
  0x20   : > { %s4795_s25 = scalar_select %p4178_p9, 1, 0 }
  0x21   : > { %s493_s21 = sadd.s32 1, %s3993_s29  ;;  %p491_p11 = scmp.eq.s32.totalorder %s490_s26, 0 }
  0x22   : > { %4796 = sst [smem:[#allocation17_spill]] %s4795_s25  ;;  %637 = sbr.rel (%p634_p10) target bundleno = 4426 (0x114a), region = 92 }
  0x23   : > { %s4186_s2 = scalar_select %p491_p11, %s3993_s29, %s493_s21  }
  0x24   : > { %s4760_s22 = sand.u32 (!%p634_p10), 1, %s3989_s28   ;;  %p733_p12 = scmp.lt.s32.totalorder (!%p634_p10), %s4001_s0, 1 }
  0x25   : > { %4797 = sst [smem:[#allocation18_spill]] %s4186_s2  ;;  %s4192_s19 = sshll.u32 (!%p634_p10), %s4760_s22, 3 }
  0x26   : > { %p738_p13 = scmp.lt.s32.totalorder (!%p634_p10), %s3997_s30, 1  ;;  %s4798_s1 = sld [smem:[#allocation19_spill]] (!%p634_p10) }
  0x27   : > { %s4801_s3 = sld [smem:[#allocation22_spill]] (!%p634_p10)  ;;  %s732_s18 = scalar_lea.vmem (!%p634_p10), [#allocation3], %s4192_s19 }
  0x28   : > { %s4802_s14 = sld [smem:[#allocation9_spill]] (!%p634_p10) }
  0x29   : > { %s734_s25 = scalar_select %p733_p12, %s4001_s0, 1 }
  0x2a   : > { %s4197_s27 = scalar_select %p738_p13, %s3997_s30, 1 }
  0x2b   : > { %s3360_s26 = sshll.u32 %s734_s25, 3 }
  0x2c   : > { %s737_s22 = scalar_lea.vmem %s4798_s1, %s3360_s26  ;;  %s3652_s15 = smul.u32 192, %s4197_s27 }
  0x2d   : > { %s3653_s16 = smul.u32 3, %s4197_s27  ;;  %s3361_s13 = sshll.u32 %s4197_s27, 6 }
  0x2e   : > { %s4216_s25 = scalar_lea.vmem %s4801_s3, %s3652_s15  ;;  %s4221_s26 = scalar_lea.vmem %s4741_s5, %s3361_s13 }
  0x2f   : > { %s4226_s28 = scalar_lea.vmem %s4740_s4, %s3653_s16  ;;  %s3362_s23 = sshll.u32 %s4197_s27, 8 }
  0x30   : > { %s3207_s13 = sshll.u32 %s4197_s27, 2  ;;  %s4245_s29 = scalar_lea.vmem %s4745_s9, %s3362_s23 }
  0x31   : > { %s4250_s0 = scalar_lea.vmem %s4746_s10, %s3207_s13  ;;  %s4255_s17 = scalar_lea.vmem %s4747_s11, %s3362_s23 }
  0x32   : > { %s783_s30 = scalar_lea.vmem %s4748_s12, %s4197_s27  ;;  %p3210_p0 = scmp.ne.s32.totalorder %s4802_s14, 0 }
  0x33   : > { %v3365_v0 = vld [vmem:[%s737_s22] sm:$0xff] (!%p3210_p0)  }
  0x34   : > { %788 = sbr.rel (%p3210_p0) target bundleno = 59 (0x3b), region = 96  ;;  %v3366_v1 = vunpack.c.l.bf16 (!%p3210_p0), %v3365_v0  ;;  %v3367_v2 = vunpack.c.h.bf16 (!%p3210_p0), %v3365_v0 }
  0x36   : > { %793 = vst [vmem:[#allocation2] sm:$0xff] (!%p3210_p0), %v3366_v1  ;;  %794 = vst [vmem:[#allocation2 + $0x8] sm:$0xff] (!%p3210_p0), %v3367_v2 }
  0x3b PF: > { %v3733_v5 = vld [vmem:[%s4216_s25 + $0x4] ss:$12 sps:$4 sm:$0xff]   ;;  %v3735_v6 = vld [vmem:[%s4216_s25] ss:$12 sps:$4 sm:$0xff]   ;;  %v4015_v7 = vmov 0.0   ;;  %v4016_v33 = vmov 0   ;;  %v873_v56 = vlaneseq  ;;  %s4807_s21 = scalar_lea.vmem %s4742_s6, %s4197_s27  ;;  %s4808_s3 = scalar_lea.vmem %s4743_s7, %s4197_s27 }
  0x3c   : > { %3480 = vmatprep.subr.bf16.mxu1 %v4015_v7  ;;  %v3736_v8 = vld [vmem:[%s4216_s25 + $0x8] ss:$12 sps:$4 sm:$0xff]   ;;  %1016 = vmatprep.subr.bf16.mxu0 %v3733_v5  ;;  %v3739_v18 = vld [vmem:[%s4216_s25 + $0x18] ss:$12 sps:$4 sm:$0xff]   ;;  %v3740_v19 = vld [vmem:[%s4216_s25 + $0x20] ss:$12 sps:$4 sm:$0xff]  }
  0x3d   : > { %v795_v3 = vld [vmem:[#allocation2] sm:$0xff]  ;;  %v796_v4 = vld [vmem:[#allocation2 + $0x8] sm:$0xff]  ;;  %1017 = vmatpush1.bf16.msra.mxu0 %v3735_v6  ;;  %3481 = vmatpush3.bf16.msra.mxu1 %v3736_v8  ;;  %v3743_v21 = vld [vmem:[%s4216_s25 + $0x30] ss:$12 sps:$4 sm:$0xff]   ;;  %vm4017_vm0 = vmmov 0   ;;  %s4805_s13 = sld [smem:[#allocation21_spill]] }
  0x3e   : > { %797 = vadd.xlane.f32.xlu0 %v795_v3  ;;  %v3737_v9 = vld [vmem:[%s4216_s25 + $0x1c] ss:$12 sps:$4 sm:$0xff]   ;;  %3482 = vmatprep.subr.bf16.mxu1 %v4015_v7  ;;  %v3741_v20 = vld [vmem:[%s4216_s25 + $0x34] ss:$12 sps:$4 sm:$0xff]   ;;  %v3744_v22 = vld [vmem:[%s4216_s25 + $0x38] ss:$12 sps:$4 sm:$0xff]  }
  0x3f   : > { %1018 = vmatprep.subr.bf16.mxu0 %v3737_v9  ;;  %v3745_v23 = vld [vmem:[%s4216_s25 + $0x4c] ss:$12 sps:$4 sm:$0xff]   ;;  %v3747_v24 = vld [vmem:[%s4216_s25 + $0x48] ss:$12 sps:$4 sm:$0xff]   ;;  %v3748_v25 = vld [vmem:[%s4216_s25 + $0x50] ss:$12 sps:$4 sm:$0xff]   ;;  %1048 = vmatprep.mubr.bf16.mxu0 %v4016_v33 }
  0x40   : > { %v3749_v26 = vld [vmem:[%s4216_s25 + $0x64] ss:$12 sps:$4 sm:$0xff]   ;;  %v3751_v27 = vld [vmem:[%s4216_s25 + $0x60] ss:$12 sps:$4 sm:$0xff]   ;;  %v3752_v28 = vld [vmem:[%s4216_s25 + $0x68] ss:$12 sps:$4 sm:$0xff]   ;;  %3496 = vmatprep.mubr.msk.bf16.mxu1 %vm4017_vm0, %v4015_v7 }
  0x41   : > { %1019 = vmatpush1.bf16.msra.mxu0 %v3739_v18  ;;  %3483 = vmatpush3.bf16.msra.mxu1 %v3740_v19  ;;  %v3753_v29 = vld [vmem:[%s4216_s25 + $0x7c] ss:$12 sps:$4 sm:$0xff]   ;;  %v3755_v30 = vld [vmem:[%s4216_s25 + $0x78] ss:$12 sps:$4 sm:$0xff]   ;;  %v3756_v31 = vld [vmem:[%s4216_s25 + $0x80] ss:$12 sps:$4 sm:$0xff]  }
  0x42   : > { %799 = vadd.xlane.f32.xlu0 %v796_v4  ;;  %3484 = vmatprep.subr.bf16.mxu1 %v4015_v7  ;;  %v3757_v32 = vld [vmem:[%s4216_s25 + $0x94] ss:$12 sps:$4 sm:$0xff]   ;;  %v3759_v34 = vld [vmem:[%s4216_s25 + $0x90] ss:$12 sps:$4 sm:$0xff]   ;;  %v3760_v35 = vld [vmem:[%s4216_s25 + $0x98] ss:$12 sps:$4 sm:$0xff]  }
  0x43   : > { %1020 = vmatprep.subr.bf16.mxu0 %v3741_v20  ;;  %v3761_v36 = vld [vmem:[%s4216_s25 + $0xac] ss:$12 sps:$4 sm:$0xff]   ;;  %v3763_v37 = vld [vmem:[%s4216_s25 + $0xa8] ss:$12 sps:$4 sm:$0xff]   ;;  %v3764_v38 = vld [vmem:[%s4216_s25 + $0xb0] ss:$12 sps:$4 sm:$0xff]   ;;  %s4806_s1 = scalar_lea.vmem %s4805_s13, %s4197_s27 }
  0x44   : > { %s4803_s25 = sld [smem:[#allocation20_spill]]  ;;  %v3212_v51 = vld [vmem:[%s4806_s1] ss:$0 sm:$0xff]  ;;  %v4325_v57 = vshrl.u32 %v873_v56, 7  ;;  %vm1105_vm1 = vcmask 261120   ;;  %vm1153_vm2 = vcmask 130048  }
  0x45   : > { %1021 = vmatpush1.bf16.msra.mxu0 %v3743_v21  ;;  %3485 = vmatpush3.bf16.msra.mxu1 %v3744_v22  ;;  %v871_v59 = vld [vmem:[%s4226_s28] sm:$0x7]  ;;  %s4018_s28 = smov 96   ;;  %s4019_s16 = smov 64  }
  0x46   : > { %3486 = vmatprep.subr.bf16.mxu1 %v4015_v7  ;;  %1022 = vmatprep.subr.bf16.mxu0 %v3745_v23  ;;  %v875_v58 = vsub.s32 0, %v4325_v57  ;;  %v883_v60 = vsub.s32 2, %v4325_v57  ;;  %v879_v61 = vsub.s32 1, %v4325_v57  ;;  %s4020_s20 = smov 32  }
  0x48   : > { %v876_v62 = vrot.slane %v871_v59, %v875_v58  ;;  %v884_v63 = vrot.slane %v871_v59, %v883_v60  ;;  %v880_v2 = vrot.slane %v871_v59, %v879_v61 }
  0x49   : > { %1023 = vmatpush1.bf16.msra.mxu0 %v3747_v24  ;;  %3487 = vmatpush3.bf16.msra.mxu1 %v3748_v25 }
  0x4a   : > { %3488 = vmatprep.subr.bf16.mxu1 %v4015_v7  ;;  %1024 = vmatprep.subr.bf16.mxu0 %v3749_v26  ;;  %s4804_s24 = scalar_lea.vmem %s4803_s25, %s4197_s27 }
  0x4b   : > { %v3211_v47 = vld [vmem:[%s4804_s24] ss:$0 sm:$0xff]  ;;  %s4809_s24 = scalar_lea.vmem %s4744_s8, %s4197_s27  ;;  %s4810_s27 = sld [smem:[#allocation9_spill]] }
  0x4d   : > { %1025 = vmatpush1.bf16.msra.mxu0 %v3751_v27  ;;  %3489 = vmatpush3.bf16.msra.mxu1 %v3752_v28 }
  0x4e   : > { %1026 = vmatprep.subr.bf16.mxu0 %v3753_v29  ;;  %3490 = vmatprep.subr.bf16.mxu1 %v4015_v7 }
  0x51   : > { %1027 = vmatpush1.bf16.msra.mxu0 %v3755_v30  ;;  %3491 = vmatpush3.bf16.msra.mxu1 %v3756_v31  ;;  %p3325_p1 = scmp.ne.s32.totalorder %s4810_s27, 1 }
  0x52   : > { %1028 = vmatprep.subr.bf16.mxu0 %v3757_v32  ;;  %3492 = vmatprep.subr.bf16.mxu1 %v4015_v7  ;;  %vm4022_vm3 = vmmov (!%p3325_p1), 0   ;;  %s4811_s23 = sld [smem:[#allocation24_spill]] (!%p3325_p1)  ;;  %s4815_s14 = sld [smem:[#allocation27_spill]] (!%p3325_p1) }
  0x55   : > { %1029 = vmatpush1.bf16.msra.mxu0 %v3759_v34  ;;  %3493 = vmatpush3.bf16.msra.mxu1 %v3760_v35 }
  0x56   : > { %1030 = vmatprep.subr.bf16.mxu0 %v3761_v36  ;;  %3494 = vmatprep.subr.bf16.mxu1 %v4015_v7 }
  0x59   : > { %1031 = vmatpush1.bf16.msra.mxu0 %v3763_v37  ;;  %3495 = vmatpush3.bf16.msra.mxu1 %v3764_v38 }
  0x5a   : > { %3506 = vmatprep.subr.bf16.mxu1 %v4015_v7  ;;  %3500 = vmatprep.subr.bf16.mxu0 %v4015_v7 }
  0xcb   : > { %v798_v10 = vpop.xlane.xlu0 %797 }
  0xcc   : > { %v802_v11 = vmul.f32 0.0078125, %v798_v10 }
  0xce   : > { %v4269_v12 = vsub.f32 %v795_v3, %v802_v11 }
  0xcf   : > { %v800_v13 = vpop.xlane.xlu0 %799 }
  0xd0   : > { %v803_v14 = vmul.f32 0.0078125, %v800_v13  ;;  %v806_v15 = vmul.f32 %v4269_v12, %v4269_v12 }
  0xd2   : > { %v4273_v16 = vsub.f32 %v796_v4, %v803_v14  ;;  %808 = vadd.xlane.f32.xlu1 %v806_v15 }
  0xd4   : > { %v807_v17 = vmul.f32 %v4273_v16, %v4273_v16 }
  0xd6   : > { %810 = vadd.xlane.f32.xlu1 %v807_v17 }
 0x15f   : > { %v809_v39 = vpop.xlane.xlu1 %808 }
 0x160   : > { %v812_v40 = vmul.f32 0.0078125, %v809_v39 }
 0x162   : > { %v814_v41 = vadd.f32 1e-05, %v812_v40 }
 0x163   : > { %v811_v42 = vpop.xlane.xlu1 %810 }
 0x164   : > { %3853 = vrsqrt.f32 %v814_v41  ;;  %v813_v43 = vmul.f32 0.0078125, %v811_v42 }
 0x166   : > { %v815_v44 = vadd.f32 1e-05, %v813_v43 }
 0x168   : > { %3855 = vrsqrt.f32 %v815_v44 }
 0x16e   : > { %v3854_v45 = vpop.eup %3853 }
 0x16f   : > { %v818_v46 = vmul.f32 %v3854_v45, %v4269_v12 }
 0x171   : > { %v827_v50 = vmul.f32 %v3211_v47, %v818_v46 }
 0x172   : > { %v3856_v48 = vpop.eup %3855 }
 0x173   : > { %v819_v49 = vmul.f32 %v3856_v48, %v4273_v16  ;;  %v836_v53 = vadd.f32 %v3212_v51, %v827_v50 }
 0x175   : > { %v828_v52 = vmul.f32 %v3211_v47, %v819_v49 }
 0x177   : > { %v837_v54 = vadd.f32 %v3212_v51, %v828_v52 }
 0x179   : > { %v838_v55 = vpack.c.bf16 %v837_v54, %v836_v53 }
 0x17b   : > { %1049 = vmatmul.mubr.bf16.vlgmr.msra.gmra.mrb[0].mxu0 %v838_v55  ;;  %3497 = vmatmul.mubr.bf16.vlgmr.msra.gmra.mrb[0].mxu1 %v838_v55 }
 0x17c   : > { %3502 = vmatprep.mubr.msk.bf16.mxu0 %vm4017_vm0, %v4015_v7  ;;  %3508 = vmatprep.mubr.msk.bf16.mxu1 %vm4017_vm0, %v4015_v7 }
 0x24e   : > { %v1050_v0 = vpop.f32.mrb[0].mxu0  ;;  %v1093_v1 = vpop.f32.mrb[0].mxu1 }
 0x24f   : > { %v1051_v3 = vadd.f32 %v1050_v0, %v876_v62  ;;  %v1052_v4 = vpop.f32.mrb[1].mxu0  ;;  %v3498_v5 = vpop.f32.mrb[1].mxu1  ;;  %v1094_v9 = vadd.f32 %v1093_v1, %v884_v63 }
 0x250   : > { %v1054_v6 = vpop.f32.mrb[2].mxu0  ;;  %v1096_v8 = vpop.f32.mrb[2].mxu1  ;;  %v1053_v14 = vadd.f32 %v1052_v4, %v880_v2 }
 0x251   : > { %v1055_v10 = vadd.f32 %v1054_v6, %v876_v62  ;;  %v1097_v11 = vadd.f32 %v1096_v8, %v884_v63  ;;  %v1056_v12 = vpop.f32.mrb[3].mxu0  ;;  %v3499_v13 = vpop.f32.mrb[3].mxu1  ;;  %v1100_v16 = vmul.f32 0.17677669, %v1051_v3  ;;  %v3767_v6 = vld [vmem:[%s4221_s26 + $0x10] sm:$0xff]   ;;  %v3768_v8 = vld [vmem:[%s4221_s26 + $0x18] sm:$0xff]  }
 0x252   : > { %v1057_v15 = vadd.f32 %v1056_v12, %v880_v2 }
 0x253   : > { %v1101_v17 = vmul.f32 0.17677669, %v1055_v10  ;;  %v4337_v18 = vpack.c.bf16 %v1097_v11, %v1094_v9 }
 0x254   : > { %v4339_v19 = vpack.c.bf16 %v1057_v15, %v1053_v14 }
 0x255   : > { %v4341_v20 = vpack.c.bf16 %v1101_v17, %v1100_v16  ;;  %3507 = vmatpush3.bf16.msra.mxu1 %v4337_v18  ;;  %v3765_v16 = vld [vmem:[%s4221_s26] sm:$0xff]  }
 0x256   : > { %1230 = vrot.lane.b32.xlu0 %v4339_v19, %s4018_s28  ;;  %v1110_v21 = vsel %vm1105_vm1, %v4339_v19, 0  ;;  %3518 = vmatprep.subr.bf16.mxu1 %v4015_v7 }
 0x257   : > { %3501 = vmatpush3.bf16.xpose.msra.mxu0 %v1110_v21  ;;  %1227 = vrot.lane.b32.xlu1 %v4341_v20, %s4018_s28  ;;  %v3766_v21 = vld [vmem:[%s4221_s26 + $0x8] sm:$0xff]  }
 0x258   : > { %3512 = vmatprep.subr.bf16.mxu0 %v4015_v7 }
 0x25e   : > { %3503 = vmatmul.mubr.msk.bf16.vlgmr.msra.gmra.mrb[4].mxu0 %vm1105_vm1, %v4341_v20 }
 0x25f   : > { %3514 = vmatprep.mubr.msk.bf16.mxu0 %vm4017_vm0, %v4015_v7 }
 0x2c8   : > { %v1231_v22 = vpop.permute.xlu0 %1230 }
 0x2c9   : > { %v1236_v23 = vsel %vm1105_vm1, %v1231_v22, 0  ;;  %v1228_v24 = vpop.permute.xlu1 %1227 }
 0x2ca   : > { %3513 = vmatpush3.bf16.xpose.msra.mxu0 %v1236_v23 }
 0x2cb   : > { %3524 = vmatprep.subr.bf16.mxu0 %v4015_v7 }
 0x2d1   : > { %3515 = vmatmul.mubr.msk.bf16.vlgmr.msra.gmra.mrb[8].mxu0 %vm1105_vm1, %v1228_v24 }
 0x2d2   : > { %3528 = vmatprep.mubr.msk.bf16.mxu0 %vm4017_vm0, %v4015_v7  ;;  %3525 = vmatpush3.bf16.msra.mxu0 %v3767_v6 }
 0x2d3   : > { %3526 = vmatprep.subr.bf16.mxu0 %v4015_v7 }
 0x2d6   : > { %3527 = vmatpush3.bf16.msra.mxu0 %v3768_v8 }
 0x2d7   : > { %3540 = vmatprep.subr.bf16.mxu0 %v4015_v7 }
 0x331   : > { %v1146_v25 = vpop.f32.mrb[4].mxu0 }
 0x332   : > { %v3504_v26 = vpop.f32.mrb[5].mxu0  ;;  %v1154_v27 = vsel %vm1153_vm2, %v1146_v25, -inf }
 0x333   : > { %1155 = vmax.xlane.f32.xlu1 %v1154_v27  ;;  %v1149_v28 = vpop.f32.mrb[6].mxu0 }
 0x334   : > { %v3505_v29 = vpop.f32.mrb[7].mxu0  ;;  %v1157_v30 = vsel %vm1153_vm2, %v1149_v28, -inf }
 0x335   : > { %1158 = vmax.xlane.f32.xlu0 %v1157_v30 }
 0x3a4   : > { %v1272_v31 = vpop.f32.mrb[8].mxu0 }
 0x3a5   : > { %v3516_v32 = vpop.f32.mrb[9].mxu0  ;;  %v1279_v34 = vsel %vm1153_vm2, %v1272_v31, -inf }
 0x3a6   : > { %1280 = vmax.xlane.f32.xlu0 %v1279_v34  ;;  %v1275_v35 = vpop.f32.mrb[10].mxu0 }
 0x3a7   : > { %v3517_v36 = vpop.f32.mrb[11].mxu0  ;;  %v1282_v37 = vsel %vm1153_vm2, %v1275_v35, -inf }
 0x3a8   : > { %1283 = vmax.xlane.f32.xlu1 %v1282_v37 }
 0x3c0   : > { %v1156_v38 = vpop.xlane.xlu1 %1155 }
 0x3c1   : > { %v1160_v39 = vsub.f32 %v1146_v25, %v1156_v38 }
 0x3c2   : > { %v1159_v40 = vpop.xlane.xlu0 %1158 }
 0x3c3   : > { %v1162_v41 = vmul.f32 1.442695, %v1160_v39  ;;  %v1161_v42 = vsub.f32 %v1149_v28, %v1159_v40 }
 0x3c5   : > { %3857 = vpow2.f32 %v1162_v41  ;;  %v1164_v43 = vmul.f32 1.442695, %v1161_v42 }
 0x3c7   : > { %3859 = vpow2.f32 %v1164_v43 }
 0x3cf   : > { %v3858_v44 = vpop.eup %3857 }
 0x3d0   : > { %v1166_v45 = vsel %vm1153_vm2, %v3858_v44, 0.0 }
 0x3d1   : > { %v3860_v46 = vpop.eup %3859  ;;  %1167 = vadd.xlane.f32.xlu0 %v1166_v45 }
 0x3d2   : > { %v1169_v47 = vsel %vm1153_vm2, %v3860_v46, 0.0 }
 0x3d3   : > { %1170 = vadd.xlane.f32.xlu1 %v1169_v47 }
 0x433   : > { %v1281_v48 = vpop.xlane.xlu0 %1280 }
 0x434   : > { %v1285_v49 = vsub.f32 %v1272_v31, %v1281_v48 }
 0x435   : > { %v1284_v50 = vpop.xlane.xlu1 %1283 }
 0x436   : > { %v1287_v51 = vmul.f32 1.442695, %v1285_v49  ;;  %v1286_v52 = vsub.f32 %v1275_v35, %v1284_v50 }
 0x438   : > { %3861 = vpow2.f32 %v1287_v51  ;;  %v1289_v53 = vmul.f32 1.442695, %v1286_v52 }
 0x43a   : > { %3863 = vpow2.f32 %v1289_v53 }
 0x442   : > { %v3862_v54 = vpop.eup %3861 }
 0x443   : > { %v1291_v55 = vsel %vm1153_vm2, %v3862_v54, 0.0 }
 0x444   : > { %v3864_v59 = vpop.eup %3863  ;;  %1292 = vadd.xlane.f32.xlu0 %v1291_v55 }
 0x445   : > { %v1294_v62 = vsel %vm1153_vm2, %v3864_v59, 0.0 }
 0x446   : > { %1295 = vadd.xlane.f32.xlu1 %v1294_v62 }
 0x457   : > { %1469 = vrot.lane.b32.xlu1 %v4339_v19, %s4019_s16 }
 0x45a   : > { %1303 = vrot.lane.b32.xlu0 %v4337_v18, %s4018_s28 }
 0x45b   : > { %1467 = vrot.lane.b32.xlu1 %v4341_v20, %s4019_s16 }
 0x45e   : > { %v1168_v63 = vpop.xlane.xlu0 %1167 }
 0x45f   : > { %3865 = vrcp.f32 %v1168_v63 }
 0x460   : > { %v1171_v0 = vpop.xlane.xlu1 %1170 }
 0x461   : > { %3867 = vrcp.f32 %v1171_v0 }
 0x469   : > { %v3866_v1 = vpop.eup %3865 }
 0x46a   : > { %v1174_v3 = vmul.f32 %v3866_v1, %v3858_v44 }
 0x46b   : > { %v3868_v2 = vpop.eup %3867 }
 0x46c   : > { %v1175_v4 = vmul.f32 %v3868_v2, %v3860_v46 }
 0x46e   : > { %v1176_v5 = vpack.c.bf16 %v1175_v4, %v1174_v3  ;;  %v3769_v3 = vld [vmem:[%s4221_s26 + $0x20] sm:$0xff]  }
 0x470   : > { %3509 = vmatmul.mubr.msk.bf16.vlgmr.msra.gmra.mrb[4].mxu1 %vm1153_vm2, %v1176_v5 }
 0x471   : > { %3520 = vmatprep.mubr.msk.bf16.mxu1 %vm4017_vm0, %v4015_v7 }
 0x4d1   : > { %v1293_v9 = vpop.xlane.xlu0 %1292 }
 0x4d2   : > { %3869 = vrcp.f32 %v1293_v9 }
 0x4d3   : > { %v1296_v10 = vpop.xlane.xlu1 %1295 }
 0x4d4   : > { %3871 = vrcp.f32 %v1296_v10 }
 0x4d5   : > { %v1304_v11 = vpop.permute.xlu0 %1303 }
 0x4d6   : > { %3519 = vmatpush3.bf16.msra.mxu1 %v1304_v11 }
 0x4d7   : > { %3532 = vmatprep.subr.bf16.mxu1 %v4015_v7  ;;  %v1470_v29 = vpop.permute.xlu1 %1469 }
 0x4d8   : > { %v1475_v34 = vsel %vm1105_vm1, %v1470_v29, 0 }
 0x4db   : > { %v1468_v35 = vpop.permute.xlu1 %1467 }
 0x4dc   : > { %v3870_v12 = vpop.eup %3869 }
 0x4dd   : > { %v1299_v14 = vmul.f32 %v3870_v12, %v3862_v54 }
 0x4de   : > { %v3872_v13 = vpop.eup %3871 }
 0x4df   : > { %v1300_v15 = vmul.f32 %v3872_v13, %v3864_v59 }
 0x4e1   : > { %v1301_v17 = vpack.c.bf16 %v1300_v15, %v1299_v14  ;;  %v3770_v14 = vld [vmem:[%s4221_s26 + $0x28] sm:$0xff]  }
 0x4e3   : > { %3521 = vmatmul.mubr.msk.bf16.vlgmr.msra.gmra.mrb[8].mxu1 %vm1153_vm2, %v1301_v17 }
 0x4e4   : > { %3533 = vmatpush3.bf16.msra.mxu1 %v3765_v16  ;;  %3536 = vmatprep.mubr.msk.bf16.mxu1 %vm4017_vm0, %v4015_v7 }
 0x4e5   : > { %3534 = vmatprep.subr.bf16.mxu1 %v4015_v7 }
 0x4e8   : > { %3535 = vmatpush3.bf16.msra.mxu1 %v3766_v21 }
 0x4e9   : > { %3546 = vmatprep.subr.bf16.mxu1 %v4015_v7 }
 0x543   : > { %v1214_v22 = vpop.f32.mrb[4].mxu1 }
 0x544   : > { %v3510_v23 = vpop.f32.mrb[5].mxu1 }
 0x545   : > { %v1217_v24 = vpop.f32.mrb[6].mxu1 }
 0x546   : > { %v1221_v25 = vpack.c.bf16 %v1217_v24, %v1214_v22  ;;  %v3511_v26 = vpop.f32.mrb[7].mxu1 }
 0x548   : > { %3537 = vmatmul.mubr.msk.bf16.vlgmr.msra.gmra.mrb[12].mxu1 %vm1105_vm1, %v1221_v25 }
 0x549   : > { %3548 = vmatprep.mubr.msk.bf16.mxu1 %vm4017_vm0, %v4015_v7 }
 0x5b6   : > { %v1343_v27 = vpop.f32.mrb[8].mxu1 }
 0x5b7   : > { %v3522_v28 = vpop.f32.mrb[9].mxu1 }
 0x5b8   : > { %v1346_v30 = vpop.f32.mrb[10].mxu1 }
 0x5b9   : > { %v1350_v31 = vpack.c.bf16 %v1346_v30, %v1343_v27  ;;  %v3523_v32 = vpop.f32.mrb[11].mxu1 }
 0x5bb   : > { %3529 = vmatmul.mubr.msk.bf16.vlgmr.msra.gmra.mrb[12].mxu0 %vm1105_vm1, %v1350_v31 }
 0x5bc   : > { %3541 = vmatpush3.bf16.xpose.msra.mxu0 %v1475_v34  ;;  %3542 = vmatprep.mubr.msk.bf16.mxu0 %vm4017_vm0, %v4015_v7 }
 0x5bd   : > { %3552 = vmatprep.subr.bf16.mxu0 %v4015_v7 }
 0x5c3   : > { %3543 = vmatmul.mubr.msk.bf16.vlgmr.msra.gmra.mrb[16].mxu0 %vm1105_vm1, %v1468_v35 }
 0x5c4   : > { %3556 = vmatprep.mubr.msk.bf16.mxu0 %vm4017_vm0, %v4015_v7  ;;  %3553 = vmatpush3.bf16.msra.mxu0 %v3769_v3  ;;  %v3257_v3 = vld [vmem:[%s4807_s21] ss:$0 sm:$0xff] }
 0x5c5   : > { %3554 = vmatprep.subr.bf16.mxu0 %v4015_v7 }
 0x5c8   : > { %3555 = vmatpush3.bf16.msra.mxu0 %v3770_v14  ;;  %v3778_v14 = vld [vmem:[%s4245_s29 + $0xc] ss:$16 sps:$4 sm:$0xff]  }
 0x5c9   : > { %3566 = vmatprep.subr.bf16.mxu0 %v4015_v7 }
 0x61b   : > { %v1460_v36 = vpop.f32.mrb[12].mxu1 }
 0x61c   : > { %v3538_v37 = vpop.f32.mrb[13].mxu1 }
 0x61d   : > { %v1463_v38 = vpop.f32.mrb[14].mxu1 }
 0x61e   : > { %v3539_v39 = vpop.f32.mrb[15].mxu1 }
 0x68e   : > { %v1404_v40 = vpop.f32.mrb[12].mxu0 }
 0x68f   : > { %v4401_v41 = vadd.f32 %v1460_v36, %v1404_v40  ;;  %v3530_v42 = vpop.f32.mrb[13].mxu0  ;;  %v3771_v40 = vld [vmem:[%s4221_s26 + $0x30] sm:$0xff]  }
 0x690   : > { %v1407_v43 = vpop.f32.mrb[14].mxu0 }
 0x691   : > { %v4403_v44 = vadd.f32 %v1463_v38, %v1407_v43  ;;  %v3531_v45 = vpop.f32.mrb[15].mxu0 }
 0x696   : > { %v1511_v46 = vpop.f32.mrb[16].mxu0 }
 0x697   : > { %v3544_v47 = vpop.f32.mrb[17].mxu0  ;;  %v1518_v48 = vsel %vm1153_vm2, %v1511_v46, -inf }
 0x698   : > { %1519 = vmax.xlane.f32.xlu1 %v1518_v48  ;;  %v1514_v49 = vpop.f32.mrb[18].mxu0 }
 0x699   : > { %v3545_v50 = vpop.f32.mrb[19].mxu0  ;;  %v1521_v51 = vsel %vm1153_vm2, %v1514_v49, -inf }
 0x69a   : > { %1522 = vmax.xlane.f32.xlu0 %v1521_v51 }
 0x6a9   : > { %1541 = vrot.lane.b32.xlu1 %v4337_v18, %s4019_s16 }
 0x6ad   : > { %1651 = vrot.lane.b32.xlu1 %v4341_v20, %s4020_s20 }
 0x725   : > { %v1520_v52 = vpop.xlane.xlu1 %1519 }
 0x726   : > { %v1524_v53 = vsub.f32 %v1511_v46, %v1520_v52 }
 0x727   : > { %v1523_v54 = vpop.xlane.xlu0 %1522 }
 0x728   : > { %v1526_v55 = vmul.f32 1.442695, %v1524_v53  ;;  %v1525_v59 = vsub.f32 %v1514_v49, %v1523_v54 }
 0x729   : > { %v1542_v62 = vpop.permute.xlu1 %1541 }
 0x72a   : > { %3873 = vpow2.f32 %v1526_v55  ;;  %v1528_v63 = vmul.f32 1.442695, %v1525_v59  ;;  %3547 = vmatpush3.bf16.msra.mxu1 %v1542_v62 }
 0x72b   : > { %3560 = vmatprep.subr.bf16.mxu1 %v4015_v7 }
 0x72c   : > { %3875 = vpow2.f32 %v1528_v63 }
 0x734   : > { %v3874_v0 = vpop.eup %3873 }
 0x735   : > { %v1530_v1 = vsel %vm1153_vm2, %v3874_v0, 0.0 }
 0x736   : > { %v3876_v2 = vpop.eup %3875  ;;  %1531 = vadd.xlane.f32.xlu0 %v1530_v1 }
 0x737   : > { %v1533_v20 = vsel %vm1153_vm2, %v3876_v2, 0.0 }
 0x73a   : > { %1534 = vadd.xlane.f32.xlu0 %v1533_v20 }
 0x750   : > { %1653 = vrot.lane.b32.xlu0 %v4339_v19, %s4020_s20  ;;  %v1652_v19 = vpop.permute.xlu1 %1651 }
 0x7c3   : > { %v1532_v4 = vpop.xlane.xlu0 %1531 }
 0x7c4   : > { %3877 = vrcp.f32 %v1532_v4  ;;  %v3893_v4 = vld [vmem:[#allocation2] sm:$0xff] }
 0x7c7   : > { %v1535_v5 = vpop.xlane.xlu0 %1534 }
 0x7c8   : > { %3879 = vrcp.f32 %v1535_v5 }
 0x7cb   : > { %v1654_v11 = vpop.permute.xlu0 %1653 }
 0x7cc   : > { %v1659_v13 = vsel %vm1105_vm1, %v1654_v11, 0 }
 0x7ce   : > { %v3878_v6 = vpop.eup %3877 }
 0x7cf   : > { %v1538_v9 = vmul.f32 %v3878_v6, %v3874_v0 }
 0x7d2   : > { %v3880_v8 = vpop.eup %3879 }
 0x7d3   : > { %v1539_v10 = vmul.f32 %v3880_v8, %v3876_v2 }
 0x7d5   : > { %v1540_v12 = vpack.c.bf16 %v1539_v10, %v1538_v9 }
 0x7d7   : > { %3549 = vmatmul.mubr.msk.bf16.vlgmr.msra.gmra.mrb[16].mxu1 %vm1153_vm2, %v1540_v12  ;;  %v3773_v12 = vld [vmem:[%s4245_s29] ss:$16 sps:$4 sm:$0xff]  }
 0x7d8   : > { %3561 = vmatpush3.bf16.xpose.msra.mxu1 %v1659_v13  ;;  %3562 = vmatprep.mubr.msk.bf16.mxu1 %vm4017_vm0, %v4015_v7  ;;  %v3775_v13 = vld [vmem:[%s4245_s29 + $0x4] ss:$16 sps:$4 sm:$0xff]  }
 0x7d9   : > { %3572 = vmatprep.subr.bf16.mxu1 %v4015_v7 }
 0x7df   : > { %3563 = vmatmul.mubr.msk.bf16.vlgmr.msra.gmra.mrb[20].mxu1 %vm1105_vm1, %v1652_v19  ;;  %v3776_v19 = vld [vmem:[%s4245_s29 + $0x8] ss:$16 sps:$4 sm:$0xff]  }
 0x7e0   : > { %3576 = vmatprep.mubr.msk.bf16.mxu1 %vm4017_vm0, %v4015_v7  ;;  %3573 = vmatpush3.bf16.msra.mxu1 %v3771_v40  ;;  %v3802_v40 = vld [vmem:[%s4245_s29 + $0x8c] ss:$16 sps:$4 sm:$0xff]  }
 0x7e1   : > { %3574 = vmatprep.subr.bf16.mxu1 %v4015_v7 }
 0x8aa   : > { %v1581_v15 = vpop.f32.mrb[16].mxu1 }
 0x8ab   : > { %v3550_v16 = vpop.f32.mrb[17].mxu1 }
 0x8ac   : > { %v1584_v17 = vpop.f32.mrb[18].mxu1  ;;  %v3784_v16 = vld [vmem:[%s4245_s29 + $0x2c] ss:$16 sps:$4 sm:$0xff]  }
 0x8ad   : > { %v1588_v21 = vpack.c.bf16 %v1584_v17, %v1581_v15  ;;  %v3551_v22 = vpop.f32.mrb[19].mxu1  ;;  %v3781_v15 = vld [vmem:[%s4245_s29 + $0x24] ss:$16 sps:$4 sm:$0xff]   ;;  %v3779_v17 = vld [vmem:[%s4245_s29 + $0x20] ss:$16 sps:$4 sm:$0xff]  }
 0x8af   : > { %3557 = vmatmul.mubr.msk.bf16.vlgmr.msra.gmra.mrb[20].mxu0 %vm1105_vm1, %v1588_v21  ;;  %v3782_v21 = vld [vmem:[%s4245_s29 + $0x28] ss:$16 sps:$4 sm:$0xff]  }
 0x8b0   : > { %3568 = vmatprep.mubr.msk.bf16.mxu0 %vm4017_vm0, %v4015_v7 }
 0x8b2   : > { %v1695_v23 = vpop.f32.mrb[20].mxu1 }
 0x8b3   : > { %v3564_v24 = vpop.f32.mrb[21].mxu1  ;;  %v1702_v25 = vsel %vm1153_vm2, %v1695_v23, -inf }
 0x8b4   : > { %1703 = vmax.xlane.f32.xlu1 %v1702_v25  ;;  %v1698_v26 = vpop.f32.mrb[22].mxu1 }
 0x8b5   : > { %v3565_v27 = vpop.f32.mrb[23].mxu1  ;;  %v1705_v28 = vsel %vm1153_vm2, %v1698_v26, -inf }
 0x8b6   : > { %1706 = vmax.xlane.f32.xlu0 %v1705_v28 }
 0x941   : > { %v1704_v29 = vpop.xlane.xlu1 %1703 }
 0x942   : > { %v1708_v30 = vsub.f32 %v1695_v23, %v1704_v29 }
 0x943   : > { %v1707_v31 = vpop.xlane.xlu0 %1706 }
 0x944   : > { %v1710_v32 = vmul.f32 1.442695, %v1708_v30  ;;  %v1709_v34 = vsub.f32 %v1698_v26, %v1707_v31  ;;  %v3787_v30 = vld [vmem:[%s4245_s29 + $0x44] ss:$16 sps:$4 sm:$0xff]   ;;  %v3790_v31 = vld [vmem:[%s4245_s29 + $0x4c] ss:$16 sps:$4 sm:$0xff]  }
 0x946   : > { %3881 = vpow2.f32 %v1710_v32  ;;  %v1712_v35 = vmul.f32 1.442695, %v1709_v34  ;;  %v3785_v32 = vld [vmem:[%s4245_s29 + $0x40] ss:$16 sps:$4 sm:$0xff]   ;;  %v3788_v34 = vld [vmem:[%s4245_s29 + $0x48] ss:$16 sps:$4 sm:$0xff]  }
 0x948   : > { %3883 = vpow2.f32 %v1712_v35  ;;  %v3793_v35 = vld [vmem:[%s4245_s29 + $0x64] ss:$16 sps:$4 sm:$0xff]  }
 0x950   : > { %v3882_v36 = vpop.eup %3881 }
 0x951   : > { %v1714_v37 = vsel %vm1153_vm2, %v3882_v36, 0.0 }
 0x952   : > { %v3884_v38 = vpop.eup %3883  ;;  %1715 = vadd.xlane.f32.xlu0 %v1714_v37  ;;  %v3791_v37 = vld [vmem:[%s4245_s29 + $0x60] ss:$16 sps:$4 sm:$0xff]  }
 0x953   : > { %v1717_v39 = vsel %vm1153_vm2, %v3884_v38, 0.0 }
 0x954   : > { %1718 = vadd.xlane.f32.xlu1 %v1717_v39  ;;  %v3799_v39 = vld [vmem:[%s4245_s29 + $0x84] ss:$16 sps:$4 sm:$0xff]  }
 0x968   : > { %1725 = vrot.lane.b32.xlu0 %v4337_v18, %s4020_s20 }
 0x982   : > { %v1642_v42 = vpop.f32.mrb[20].mxu0 }
 0x983   : > { %v1649_v43 = vadd.f32 %v1642_v42, %v4401_v41  ;;  %v3558_v45 = vpop.f32.mrb[21].mxu0  ;;  %v3772_v41 = vld [vmem:[%s4221_s26 + $0x38] sm:$0xff]   ;;  %v3797_v42 = vld [vmem:[%s4245_s29 + $0x80] ss:$16 sps:$4 sm:$0xff]   ;;  %s4812_s26 = sld [smem:[#allocation23_spill]] (!%p3325_p1) }
 0x984   : > { %v1645_v46 = vpop.f32.mrb[22].mxu0  ;;  %3575 = vmatpush3.bf16.msra.mxu1 %v3772_v41  ;;  %v3805_v45 = vld [vmem:[%s4245_s29 + $0xa4] ss:$16 sps:$4 sm:$0xff]  }
 0x985   : > { %v1650_v47 = vadd.f32 %v1645_v46, %v4403_v44  ;;  %v3559_v48 = vpop.f32.mrb[23].mxu0  ;;  %2144 = vmatprep.subr.bf16.mxu1 %v3778_v14  ;;  %v3808_v46 = vld [vmem:[%s4245_s29 + $0xac] ss:$16 sps:$4 sm:$0xff]   ;;  %v3821_v41 = vld [vmem:[%s4255_s17 + $0x40] sm:$0xff]  }
 0x986   : > { %v3806_v48 = vld [vmem:[%s4245_s29 + $0xa8] ss:$16 sps:$4 sm:$0xff]  }
 0x9df   : > { %v1716_v49 = vpop.xlane.xlu0 %1715 }
 0x9e0   : > { %3885 = vrcp.f32 %v1716_v49  ;;  %v3811_v49 = vld [vmem:[%s4245_s29 + $0xc4] ss:$16 sps:$4 sm:$0xff]  }
 0x9e1   : > { %v1719_v50 = vpop.xlane.xlu1 %1718 }
 0x9e2   : > { %3887 = vrcp.f32 %v1719_v50  ;;  %v3814_v50 = vld [vmem:[%s4245_s29 + $0xcc] ss:$16 sps:$4 sm:$0xff]  }
 0x9e3   : > { %v1726_v51 = vpop.permute.xlu0 %1725 }
 0x9e4   : > { %3567 = vmatpush3.bf16.msra.mxu0 %v1726_v51  ;;  %v3809_v51 = vld [vmem:[%s4245_s29 + $0xc0] ss:$16 sps:$4 sm:$0xff]  }
 0x9e5   : > { %2101 = vmatprep.subr.bf16.mxu0 %v3775_v13  ;;  %v3823_v13 = vld [vmem:[%s4255_s17] sm:$0xff]  }
 0x9ea   : > { %v3886_v18 = vpop.eup %3885 }
 0x9eb   : > { %v1722_v53 = vmul.f32 %v3886_v18, %v3882_v36  ;;  %v3796_v36 = vld [vmem:[%s4245_s29 + $0x6c] ss:$16 sps:$4 sm:$0xff]   ;;  %v3812_v18 = vld [vmem:[%s4245_s29 + $0xc8] ss:$16 sps:$4 sm:$0xff]  }
 0x9ec   : > { %v3888_v52 = vpop.eup %3887 }
 0x9ed   : > { %v1723_v54 = vmul.f32 %v3888_v52, %v3884_v38  ;;  %v3794_v38 = vld [vmem:[%s4245_s29 + $0x68] ss:$16 sps:$4 sm:$0xff]   ;;  %v3817_v52 = vld [vmem:[%s4245_s29 + $0xe4] ss:$16 sps:$4 sm:$0xff]  }
 0x9ef   : > { %v1724_v7 = vpack.c.bf16 %v1723_v54, %v1722_v53  ;;  %v3820_v53 = vld [vmem:[%s4245_s29 + $0xec] ss:$16 sps:$4 sm:$0xff]   ;;  %v3815_v54 = vld [vmem:[%s4245_s29 + $0xe0] ss:$16 sps:$4 sm:$0xff]  }
 0x9f1   : > { %3569 = vmatmul.mubr.msk.bf16.vlgmr.msra.gmra.mrb[24].mxu0 %vm1153_vm2, %v1724_v7  ;;  %v3818_v7 = vld [vmem:[%s4245_s29 + $0xe8] ss:$16 sps:$4 sm:$0xff]  }
 0x9f2   : > { %2133 = vmatprep.mubr.bf16.mxu0 %v4016_v33  ;;  %2102 = vmatpush1.bf16.msra.mxu0 %v3773_v12 }
 0x9f3   : > { %2103 = vmatprep.subr.bf16.mxu0 %v3781_v15  ;;  %v3825_v15 = vld [vmem:[%s4255_s17 + $0x48] sm:$0xff]  }
 0x9f6   : > { %2104 = vmatpush1.bf16.msra.mxu0 %v3779_v17  ;;  %v3827_v17 = vld [vmem:[%s4255_s17 + $0x8] sm:$0xff]  }
 0x9f7   : > { %2105 = vmatprep.subr.bf16.mxu0 %v3787_v30  ;;  %v3837_v30 = vld [vmem:[%s4255_s17 + $0x60] sm:$0xff]  }
 0x9fa   : > { %2106 = vmatpush1.bf16.msra.mxu0 %v3785_v32  ;;  %v3839_v32 = vld [vmem:[%s4255_s17 + $0x20] sm:$0xff]  }
 0x9fb   : > { %2107 = vmatprep.subr.bf16.mxu0 %v3793_v35  ;;  %v3841_v35 = vld [vmem:[%s4255_s17 + $0x68] sm:$0xff]  }
 0x9fe   : > { %2108 = vmatpush1.bf16.msra.mxu0 %v3791_v37  ;;  %v3843_v37 = vld [vmem:[%s4255_s17 + $0x28] sm:$0xff]  }
 0x9ff   : > { %2109 = vmatprep.subr.bf16.mxu0 %v3799_v39  ;;  %v3845_v39 = vld [vmem:[%s4255_s17 + $0x70] sm:$0xff]  }
 0xa02   : > { %2110 = vmatpush1.bf16.msra.mxu0 %v3797_v42  ;;  %v3847_v42 = vld [vmem:[%s4255_s17 + $0x30] sm:$0xff]  }
 0xa03   : > { %2111 = vmatprep.subr.bf16.mxu0 %v3805_v45  ;;  %v3849_v45 = vld [vmem:[%s4255_s17 + $0x78] sm:$0xff]  }
 0xac4   : > { %v1765_v44 = vpop.f32.mrb[24].mxu0 }
 0xac5   : > { %v3570_v55 = vpop.f32.mrb[25].mxu0 }
 0xac6   : > { %v1768_v59 = vpop.f32.mrb[26].mxu0 }
 0xac7   : > { %v1772_v62 = vpack.c.bf16 %v1768_v59, %v1765_v44  ;;  %v3571_v63 = vpop.f32.mrb[27].mxu0  ;;  %v3822_v44 = vld [vmem:[%s4255_s17 + $0xc0] sm:$0xff]  }
 0xac9   : > { %3577 = vmatmul.mubr.msk.bf16.vlgmr.msra.gmra.mrb[24].mxu1 %vm1105_vm1, %v1772_v62 }
 0xaca   : > { %2176 = vmatprep.mubr.bf16.mxu1 %v4016_v33  ;;  %v3894_v33 = vld [vmem:[#allocation2 + $0x8] sm:$0xff]  ;;  %2145 = vmatpush1.bf16.msra.mxu1 %v3776_v19  ;;  %v3824_v19 = vld [vmem:[%s4255_s17 + $0x80] sm:$0xff]  }
 0xacb   : > { %2146 = vmatprep.subr.bf16.mxu1 %v3784_v16  ;;  %v3826_v16 = vld [vmem:[%s4255_s17 + $0xc8] sm:$0xff]  }
 0xace   : > { %2147 = vmatpush1.bf16.msra.mxu1 %v3782_v21  ;;  %v3828_v21 = vld [vmem:[%s4255_s17 + $0x88] sm:$0xff]  }
 0xacf   : > { %2148 = vmatprep.subr.bf16.mxu1 %v3790_v31  ;;  %v3838_v31 = vld [vmem:[%s4255_s17 + $0xe0] sm:$0xff]  }
 0xad2   : > { %2149 = vmatpush1.bf16.msra.mxu1 %v3788_v34  ;;  %v3840_v34 = vld [vmem:[%s4255_s17 + $0xa0] sm:$0xff]  }
 0xad3   : > { %2150 = vmatprep.subr.bf16.mxu1 %v3796_v36  ;;  %v3842_v36 = vld [vmem:[%s4255_s17 + $0xe8] sm:$0xff]  }
 0xad6   : > { %2151 = vmatpush1.bf16.msra.mxu1 %v3794_v38  ;;  %v3844_v38 = vld [vmem:[%s4255_s17 + $0xa8] sm:$0xff]  }
 0xad7   : > { %2152 = vmatprep.subr.bf16.mxu1 %v3802_v40  ;;  %v3846_v40 = vld [vmem:[%s4255_s17 + $0xf0] sm:$0xff]  }
 0xb9c   : > { %v1826_v0 = vpop.f32.mrb[24].mxu1 }
 0xb9d   : > { %v1833_v1 = vadd.f32 %v1826_v0, %v1649_v43  ;;  %v3578_v2 = vpop.f32.mrb[25].mxu1  ;;  %v3800_v43 = vld [vmem:[%s4245_s29 + $0x88] ss:$16 sps:$4 sm:$0xff]  }
 0xb9e   : > { %v1829_v20 = vpop.f32.mrb[26].mxu1  ;;  %2153 = vmatpush1.bf16.msra.mxu1 %v3800_v43  ;;  %v3848_v43 = vld [vmem:[%s4255_s17 + $0xb0] sm:$0xff]  }
 0xb9f   : > { %v1835_v5 = vadd.f32 %v3893_v4, %v1833_v1  ;;  %v1834_v6 = vadd.f32 %v1829_v20, %v1650_v47  ;;  %v3579_v8 = vpop.f32.mrb[27].mxu1  ;;  %v3803_v47 = vld [vmem:[%s4245_s29 + $0xa0] ss:$16 sps:$4 sm:$0xff]   ;;  %2154 = vmatprep.subr.bf16.mxu1 %v3808_v46  ;;  %v3850_v46 = vld [vmem:[%s4255_s17 + $0xf8] sm:$0xff]  }
 0xba0   : > { %2112 = vmatpush1.bf16.msra.mxu0 %v3803_v47  ;;  %v3259_v8 = vld [vmem:[%s4809_s24] ss:$0 sm:$0xff]  ;;  %v3851_v47 = vld [vmem:[%s4255_s17 + $0x38] sm:$0xff]  }
 0xba1   : > { %v1836_v9 = vadd.f32 %v3894_v33, %v1834_v6  ;;  %v4451_v10 = vadd.f32 %v3257_v3, %v1835_v5  ;;  %2113 = vmatprep.subr.bf16.mxu0 %v3811_v49  ;;  %v1919_v49 = vld [vmem:[%s4250_s0] sm:$0xf]  ;;  %s4814_s0 = sld [smem:[#allocation25_spill]] (!%p3325_p1) }
 0xba2   : > { %2155 = vmatpush1.bf16.msra.mxu1 %v3806_v48  ;;  %v3852_v48 = vld [vmem:[%s4255_s17 + $0xb8] sm:$0xff]  }
 0xba3   : > { %1846 = vadd.xlane.f32.xlu1 %v4451_v10  ;;  %v4454_v11 = vadd.f32 %v3257_v3, %v1836_v9  ;;  %2156 = vmatprep.subr.bf16.mxu1 %v3814_v50  ;;  %v3258_v3 = vld [vmem:[%s4808_s3] ss:$0 sm:$0xff]  ;;  %v1935_v50 = vsub.s32 3, %v4325_v57 }
 0xba4   : > { %2114 = vmatpush1.bf16.msra.mxu0 %v3809_v51  ;;  %v1924_v51 = vrot.slane %v1919_v49, %v875_v58 }
 0xba5   : > { %2115 = vmatprep.subr.bf16.mxu0 %v3817_v52  ;;  %v1928_v52 = vrot.slane %v1919_v49, %v879_v61 }
 0xba6   : > { %2157 = vmatpush1.bf16.msra.mxu1 %v3812_v18  ;;  %v1932_v18 = vrot.slane %v1919_v49, %v883_v60 }
 0xba7   : > { %1848 = vadd.xlane.f32.xlu1 %v4454_v11  ;;  %2158 = vmatprep.subr.bf16.mxu1 %v3820_v53  ;;  %v1936_v53 = vrot.slane %v1919_v49, %v1935_v50  ;;  %v3895_v50 = vld [vmem:[%s4812_s26] sm:$0xff] (!%p3325_p1)  }
 0xba8   : > { %2116 = vmatpush1.bf16.msra.mxu0 %v3815_v54 }
 0xba9   : > { %3405 = vmatprep.subr.bf16.mxu0 %v3821_v41 }
 0xbaa   : > { %2159 = vmatpush1.bf16.msra.mxu1 %v3818_v7 }
 0xbab   : > { %3427 = vmatprep.subr.bf16.mxu1 %v3822_v44 }
 0xc30   : > { %v1847_v22 = vpop.xlane.xlu1 %1846 }
 0xc31   : > { %v1850_v23 = vmul.f32 0.0078125, %v1847_v22  ;;  %v3829_v22 = vld [vmem:[%s4255_s17 + $0x50] sm:$0xff]  }
 0xc33   : > { %v4466_v24 = vsub.f32 %v4451_v10, %v1850_v23  ;;  %v3830_v23 = vld [vmem:[%s4255_s17 + $0xd0] sm:$0xff]  }
 0xc34   : > { %v1849_v25 = vpop.xlane.xlu1 %1848 }
 0xc35   : > { %v1851_v26 = vmul.f32 0.0078125, %v1849_v25  ;;  %v1854_v27 = vmul.f32 %v4466_v24, %v4466_v24  ;;  %v3832_v25 = vld [vmem:[%s4255_s17 + $0x90] sm:$0xff]  }
 0xc37   : > { %v4471_v28 = vsub.f32 %v4454_v11, %v1851_v26  ;;  %1856 = vadd.xlane.f32.xlu1 %v1854_v27  ;;  %v3833_v26 = vld [vmem:[%s4255_s17 + $0x58] sm:$0xff]  }
 0xc38   : > { %v3834_v27 = vld [vmem:[%s4255_s17 + $0xd8] sm:$0xff]  }
 0xc39   : > { %v1855_v29 = vmul.f32 %v4471_v28, %v4471_v28 }
 0xc3b   : > { %1858 = vadd.xlane.f32.xlu1 %v1855_v29  ;;  %v3836_v29 = vld [vmem:[%s4255_s17 + $0x98] sm:$0xff]  }
 0xcc4   : > { %v1857_v55 = vpop.xlane.xlu1 %1856 }
 0xcc5   : > { %v1860_v59 = vmul.f32 0.0078125, %v1857_v55 }
 0xcc7   : > { %v1862_v62 = vadd.f32 1e-05, %v1860_v59 }
 0xcc8   : > { %v1859_v63 = vpop.xlane.xlu1 %1858 }
 0xcc9   : > { %3889 = vrsqrt.f32 %v1862_v62  ;;  %v1861_v0 = vmul.f32 0.0078125, %v1859_v63 }
 0xccb   : > { %v1863_v1 = vadd.f32 1e-05, %v1861_v0 }
 0xccd   : > { %3891 = vrsqrt.f32 %v1863_v1 }
 0xcd3   : > { %v3890_v2 = vpop.eup %3889 }
 0xcd4   : > { %v1866_v20 = vmul.f32 %v3890_v2, %v4466_v24  ;;  %v3831_v24 = vld [vmem:[%s4255_s17 + $0x10] sm:$0xff]  }
 0xcd6   : > { %v1875_v6 = vmul.f32 %v3258_v3, %v1866_v20 }
 0xcd7   : > { %v3892_v4 = vpop.eup %3891 }
 0xcd8   : > { %v1867_v5 = vmul.f32 %v3892_v4, %v4471_v28  ;;  %v1884_v9 = vadd.f32 %v3259_v8, %v1875_v6  ;;  %v3835_v28 = vld [vmem:[%s4255_s17 + $0x18] sm:$0xff]   ;;  %s4813_s17 = sld [smem:[#allocation26_spill]] (!%p3325_p1) }
 0xcda   : > { %v1876_v33 = vmul.f32 %v3258_v3, %v1867_v5 }
 0xcdc   : > { %v1885_v12 = vadd.f32 %v3259_v8, %v1876_v33 }
 0xcde   : > { %v1886_v14 = vpack.c.bf16 %v1885_v12, %v1884_v9 }
 0xce0   : > { %2134 = vmatmul.mubr.bf16.vlgmr.msra.gmra.mrb[28].mxu0 %v1886_v14  ;;  %2177 = vmatmul.mubr.bf16.vlgmr.msra.gmra.mrb[28].mxu1 %v1886_v14 }
 0xce1   : > { %3406 = vmatpush3.bf16.msra.mxu0 %v3823_v13  ;;  %3428 = vmatpush3.bf16.msra.mxu1 %v3824_v19 }
 0xce2   : > { %3407 = vmatprep.subr.bf16.mxu0 %v3825_v15  ;;  %3429 = vmatprep.subr.bf16.mxu1 %v3826_v16 }
 0xce5   : > { %3408 = vmatpush3.bf16.msra.mxu0 %v3827_v17  ;;  %3430 = vmatpush3.bf16.msra.mxu1 %v3828_v21 }
 0xce6   : > { %3409 = vmatprep.subr.bf16.mxu0 %v3829_v22  ;;  %3431 = vmatprep.subr.bf16.mxu1 %v3830_v23  ;;  %v3292_v22 = vld [vmem:[%s783_s30] ss:$0 sm:$0xff] }
 0xce9   : > { %3410 = vmatpush3.bf16.msra.mxu0 %v3831_v24  ;;  %3432 = vmatpush3.bf16.msra.mxu1 %v3832_v25 }
 0xcea   : > { %3411 = vmatprep.subr.bf16.mxu0 %v3833_v26  ;;  %3433 = vmatprep.subr.bf16.mxu1 %v3834_v27 }
 0xced   : > { %3412 = vmatpush3.bf16.msra.mxu0 %v3835_v28  ;;  %3434 = vmatpush3.bf16.msra.mxu1 %v3836_v29 }
 0xcee   : > { %3413 = vmatprep.subr.bf16.mxu0 %v3837_v30  ;;  %3435 = vmatprep.subr.bf16.mxu1 %v3838_v31 }
 0xcf1   : > { %3414 = vmatpush3.bf16.msra.mxu0 %v3839_v32  ;;  %3436 = vmatpush3.bf16.msra.mxu1 %v3840_v34 }
 0xcf2   : > { %3415 = vmatprep.subr.bf16.mxu0 %v3841_v35  ;;  %3437 = vmatprep.subr.bf16.mxu1 %v3842_v36 }
 0xcf5   : > { %3416 = vmatpush3.bf16.msra.mxu0 %v3843_v37  ;;  %3438 = vmatpush3.bf16.msra.mxu1 %v3844_v38 }
 0xcf6   : > { %3417 = vmatprep.subr.bf16.mxu0 %v3845_v39  ;;  %3439 = vmatprep.subr.bf16.mxu1 %v3846_v40 }
 0xcf9   : > { %3418 = vmatpush3.bf16.msra.mxu0 %v3847_v42  ;;  %3440 = vmatpush3.bf16.msra.mxu1 %v3848_v43  ;;  %v2554_v42 = vand.u32 (!%p3325_p1), 127, %v873_v56  ;;  %v4021_v43 = vmov (!%p3325_p1), 0.0   ;;  %v3897_v56 = vld [vmem:[%s4811_s23] sm:$0xff] (!%p3325_p1)  }
 0xcfa   : > { %3419 = vmatprep.subr.bf16.mxu0 %v3849_v45  ;;  %3441 = vmatprep.subr.bf16.mxu1 %v3850_v46 }
 0xcfd   : > { %3420 = vmatpush3.bf16.msra.mxu0 %v3851_v47  ;;  %3442 = vmatpush3.bf16.msra.mxu1 %v3852_v48  ;;  %v3901_v48 = vld [vmem:[%s4811_s23 + $0x10] sm:$0xff] (!%p3325_p1)  }
 0xcfe   : > { %3580 = vmatprep.subr.bf16.mxu1 (!%p3325_p1), %v4021_v43  ;;  %3592 = vmatprep.subr.bf16.mxu0 (!%p3325_p1), %v4021_v43 }
 0xdb3   : > { %v2135_v54 = vpop.f32.mrb[28].mxu0  ;;  %v2178_v7 = vpop.f32.mrb[28].mxu1 }
 0xdb4   : > { %v2136_v41 = vadd.f32 %v2135_v54, %v1924_v51  ;;  %v2179_v44 = vadd.f32 %v2178_v7, %v1932_v18  ;;  %v2137_v55 = vpop.f32.mrb[29].mxu0  ;;  %v2180_v59 = vpop.f32.mrb[29].mxu1  ;;  %v3900_v54 = vld [vmem:[%s4812_s26 + $0x18] sm:$0xff] (!%p3325_p1)   ;;  %v3902_v7 = vld [vmem:[%s4812_s26 + $0x20] sm:$0xff] (!%p3325_p1)  }
 0xdb5   : > { %v2138_v62 = vadd.f32 %v2137_v55, %v1928_v52  ;;  %v2181_v63 = vadd.f32 %v2180_v59, %v1936_v53  ;;  %v2139_v0 = vpop.f32.mrb[30].mxu0  ;;  %v2182_v1 = vpop.f32.mrb[30].mxu1  ;;  %v3907_v55 = vld [vmem:[%s4811_s23 + $0x28] sm:$0xff] (!%p3325_p1)   ;;  %v3908_v59 = vld [vmem:[%s4812_s26 + $0x38] sm:$0xff] (!%p3325_p1)  }
 0xdb6   : > { %v2140_v2 = vadd.f32 %v2139_v0, %v1924_v51  ;;  %v2183_v20 = vadd.f32 %v2182_v1, %v1932_v18  ;;  %v2141_v58 = vpop.f32.mrb[31].mxu0  ;;  %v2184_v3 = vpop.f32.mrb[31].mxu1  ;;  %v2187_v5 = vmax.f32 %v2136_v41, 0.0  ;;  %v2189_v6 = vmax.f32 %v2179_v44, 0.0  ;;  %v3903_v51 = vld [vmem:[%s4811_s23 + $0x18] sm:$0xff] (!%p3325_p1)   ;;  %v3896_v18 = vld [vmem:[%s4812_s26 + $0x8] sm:$0xff] (!%p3325_p1)  }
 0xdb7   : > { %v2142_v4 = vadd.f32 %v2141_v58, %v1928_v52  ;;  %v2185_v60 = vadd.f32 %v2184_v3, %v1936_v53  ;;  %v2188_v33 = vmax.f32 %v2138_v62, 0.0  ;;  %v2190_v9 = vmax.f32 %v2181_v63, 0.0  ;;  %v3905_v52 = vld [vmem:[%s4811_s23 + $0x20] sm:$0xff] (!%p3325_p1)   ;;  %v3898_v53 = vld [vmem:[%s4812_s26 + $0x10] sm:$0xff] (!%p3325_p1)   ;;  %v3904_v41 = vld [vmem:[%s4812_s26 + $0x28] sm:$0xff] (!%p3325_p1)  }
 0xdb8   : > { %v2191_v61 = vmax.f32 %v2140_v2, 0.0  ;;  %v2193_v8 = vmax.f32 %v2183_v20, 0.0  ;;  %v3906_v44 = vld [vmem:[%s4812_s26 + $0x30] sm:$0xff] (!%p3325_p1)   ;;  %v3910_v63 = vld [vmem:[%s4811_s23 + $0x38] sm:$0xff] (!%p3325_p1)  }
 0xdb9   : > { %v2192_v12 = vmax.f32 %v2142_v4, 0.0  ;;  %v2194_v13 = vmax.f32 %v2185_v60, 0.0  ;;  %v3909_v62 = vld [vmem:[%s4811_s23 + $0x30] sm:$0xff] (!%p3325_p1)   ;;  %v3911_v4 = vld [vmem:[%s4813_s17] sm:$0xff] (!%p3325_p1)  }
 0xdba   : > { %v2195_v19 = vpack.c.bf16 %v2191_v61, %v2187_v5  ;;  %v2197_v14 = vpack.c.bf16 %v2193_v8, %v2189_v6  ;;  %v3912_v8 = vld [vmem:[%s4813_s17 + $0x8] sm:$0xff] (!%p3325_p1)  }
 0xdbb   : > { %v2196_v15 = vpack.c.bf16 %v2192_v12, %v2188_v33  ;;  %v2198_v16 = vpack.c.bf16 %v2194_v13, %v2190_v9  ;;  %v3913_v33 = vld [vmem:[%s4813_s17 + $0x10] sm:$0xff] (!%p3325_p1)   ;;  %v3914_v9 = vld [vmem:[%s4813_s17 + $0x18] sm:$0xff] (!%p3325_p1)   ;;  %v3915_v12 = vld [vmem:[%s4813_s17 + $0x20] sm:$0xff] (!%p3325_p1)  }
 0xdbc   : > { %v3916_v13 = vld [vmem:[%s4813_s17 + $0x28] sm:$0xff] (!%p3325_p1)  }
 0xdbd   : > { %2494 = vmatprep.mubr.bf16.mxu0 %v2196_v15  ;;  %2535 = vmatprep.mubr.bf16.mxu1 %v2198_v16 }
 0xdbe   : > { %2495 = vmatmul.mubr.bf16.vlgmr.msra.gmra.mrb[32].mxu0 %v2195_v19  ;;  %2536 = vmatmul.mubr.bf16.vlgmr.msra.gmra.mrb[32].mxu1 %v2197_v14  ;;  %v3917_v19 = vld [vmem:[%s4813_s17 + $0x30] sm:$0xff] (!%p3325_p1)   ;;  %v3918_v14 = vld [vmem:[%s4813_s17 + $0x38] sm:$0xff] (!%p3325_p1)  }
 0xdbf   : > { %3582 = vmatprep.mubr.msk.bf16.mxu1 (!%p3325_p1), %vm4022_vm3, %v4021_v43  ;;  %3608 = vmatprep.mubr.msk.bf16.mxu0 (!%p3325_p1), %vm4022_vm3, %v4021_v43 }
 0xdc0   : > { %3593 = vmatpush3.bf16.msra.mxu0 (!%p3325_p1), %v3897_v56 }
 0xdc1   : > { %3594 = vmatprep.subr.bf16.mxu0 (!%p3325_p1), %v4021_v43 }
 0xe91   : > { %v3421_v17 = vpop.f32.mrb[32].mxu0  ;;  %v3443_v21 = vpop.f32.mrb[32].mxu1 }
 0xe92   : > { %v3422_v23 = vpop.f32.mrb[33].mxu0  ;;  %v3444_v24 = vpop.f32.mrb[33].mxu1 }
 0xe93   : > { %v3423_v25 = vadd.f32 %v3422_v23, %v3421_v17  ;;  %v3445_v26 = vadd.f32 %v3444_v24, %v3443_v21  ;;  %v3424_v27 = vpop.f32.mrb[34].mxu0  ;;  %v3446_v28 = vpop.f32.mrb[34].mxu1  ;;  %v3346_v23 = vld [vmem:[%s4814_s0] ss:$0 sm:$0xff] (!%p3325_p1) }
 0xe94   : > { %v3425_v29 = vpop.f32.mrb[35].mxu0  ;;  %v3447_v30 = vpop.f32.mrb[35].mxu1 }
 0xe95   : > { %v2497_v31 = vadd.f32 %v3423_v25, %v3292_v22  ;;  %v3426_v32 = vadd.f32 %v3425_v29, %v3424_v27  ;;  %v3448_v34 = vadd.f32 %v3447_v30, %v3446_v28  ;;  %v3347_v30 = vld [vmem:[%s4815_s14] ss:$0 sm:$0xff] (!%p3325_p1) }
 0xe97   : > { %v2538_v35 = vadd.f32 %v3445_v26, %v2497_v31  ;;  %v2500_v36 = vadd.f32 %v3426_v32, %v3292_v22  ;;  %2551 = sbr.rel (%p3325_p1) target bundleno = 4401 (0x1131), region = 100 }
 0xe99   : > { %v2544_v37 = vadd.f32 %v2538_v35, %v4451_v10  ;;  %v2541_v38 = vadd.f32 %v3448_v34, %v2500_v36  ;;  %v2557_v10 = vmul.u32 (!%p3325_p1), 2, %v4325_v57  ;;  %v3899_v57 = vld [vmem:[%s4811_s23 + $0x8] sm:$0xff] (!%p3325_p1)  }
 0xe9a   : > { %3595 = vmatpush3.bf16.msra.mxu0 (!%p3325_p1), %v3899_v57 }
 0xe9b   : > { %2546 = vst [vmem:[#allocation2] sm:$0xff] %v2544_v37  ;;  %v2545_v39 = vadd.f32 %v2541_v38, %v4454_v11  ;;  %vm2558_vm4 = vcmp.eq.s32.totalorder (!%p3325_p1), %v2554_v42, %v2557_v10  ;;  %v2562_v11 = vadd.s32 (!%p3325_p1), 1, %v2557_v10  ;;  %3596 = vmatprep.subr.bf16.mxu0 (!%p3325_p1), %v4021_v43 }
 0xe9c   : > { %v3326_v45 = vsel (!%p3325_p1), %vm2558_vm4, 1.0, %v4021_v43 }
 0xe9d   : > { %2547 = vst [vmem:[#allocation2 + $0x8] sm:$0xff] %v2545_v39  ;;  %v2552_v40 = vpack.c.bf16 (!%p3325_p1), %v2545_v39, %v2544_v37  ;;  %v2561_v46 = vpack.c.bf16 (!%p3325_p1), %v3326_v45, %v3326_v45  ;;  %vm2563_vm5 = vcmp.eq.s32.totalorder (!%p3325_p1), %v2554_v42, %v2562_v11 }
 0xe9e   : > { %v3327_v47 = vsel %vm2563_vm5, 1.0, %v4021_v43  ;;  %3597 = vmatpush3.bf16.msra.mxu0 %v3901_v48 }
 0xe9f   : > { %3581 = vmatpush3.bf16.msra.mxu1 %v2552_v40  ;;  %v2566_v49 = vpack.c.bf16 %v3327_v47, %v3327_v47  ;;  %3598 = vmatprep.subr.bf16.mxu0 %v4021_v43 }
 0xea0   : > { %3586 = vmatprep.subr.bf16.mxu1 %v4021_v43 }
 0xea2   : > { %3583 = vmatmul.mubr.msk.bf16.vlgmr.msra.gmra.mrb[0].mxu1 %vm1153_vm2, %v2561_v46  ;;  %3599 = vmatpush3.bf16.msra.mxu0 %v3903_v51 }
 0xea3   : > { %3587 = vmatpush3.bf16.msra.mxu1 %v2552_v40  ;;  %3588 = vmatprep.mubr.msk.bf16.mxu1 %vm4022_vm3, %v4021_v43 }
 0xea4   : > { %3612 = vmatprep.subr.bf16.mxu1 %v4021_v43  ;;  %3600 = vmatprep.subr.bf16.mxu0 %v4021_v43 }
 0xea6   : > { %3601 = vmatpush3.bf16.msra.mxu0 %v3905_v52 }
 0xea7   : > { %3602 = vmatprep.subr.bf16.mxu0 %v4021_v43 }
 0xeaa   : > { %3589 = vmatmul.mubr.msk.bf16.vlgmr.msra.gmra.mrb[4].mxu1 %vm1153_vm2, %v2566_v49  ;;  %3603 = vmatpush3.bf16.msra.mxu0 %v3907_v55 }
 0xeab   : > { %3613 = vmatpush3.bf16.msra.mxu1 %v3895_v50  ;;  %3628 = vmatprep.mubr.msk.bf16.mxu1 %vm4022_vm3, %v4021_v43 }
 0xeac   : > { %3614 = vmatprep.subr.bf16.mxu1 %v4021_v43  ;;  %3604 = vmatprep.subr.bf16.mxu0 %v4021_v43 }
 0xeae   : > { %3605 = vmatpush3.bf16.msra.mxu0 %v3909_v62 }
 0xeaf   : > { %3615 = vmatpush3.bf16.msra.mxu1 %v3896_v18  ;;  %3606 = vmatprep.subr.bf16.mxu0 %v4021_v43 }
 0xeb0   : > { %3616 = vmatprep.subr.bf16.mxu1 %v4021_v43 }
 0xeb2   : > { %3607 = vmatpush3.bf16.msra.mxu0 %v3910_v63 }
 0xeb3   : > { %3617 = vmatpush3.bf16.msra.mxu1 %v3898_v53  ;;  %3632 = vmatprep.subr.bf16.mxu0 %v4021_v43 }
 0xeb4   : > { %3618 = vmatprep.subr.bf16.mxu1 %v4021_v43 }
 0xeb7   : > { %3619 = vmatpush3.bf16.msra.mxu1 %v3900_v54 }
 0xeb8   : > { %3620 = vmatprep.subr.bf16.mxu1 %v4021_v43 }
 0xebb   : > { %3621 = vmatpush3.bf16.msra.mxu1 %v3902_v7 }
 0xebc   : > { %3622 = vmatprep.subr.bf16.mxu1 %v4021_v43 }
 0xebf   : > { %3623 = vmatpush3.bf16.msra.mxu1 %v3904_v41 }
 0xec0   : > { %3624 = vmatprep.subr.bf16.mxu1 %v4021_v43 }
 0xec3   : > { %3625 = vmatpush3.bf16.msra.mxu1 %v3906_v44 }
 0xec4   : > { %3626 = vmatprep.subr.bf16.mxu1 %v4021_v43 }
 0xec7   : > { %3627 = vmatpush3.bf16.msra.mxu1 %v3908_v59 }
 0xf75   : > { %v2604_v0 = vpop.f32.mrb[0].mxu1 }
 0xf76   : > { %v2653_v1 = vpack.c.bf16 %v2604_v0, %v2604_v0  ;;  %v3584_v2 = vpop.f32.mrb[1].mxu1 }
 0xf77   : > { %v2607_v20 = vpop.f32.mrb[2].mxu1 }
 0xf78   : > { %v3585_v58 = vpop.f32.mrb[3].mxu1  ;;  %3629 = vmatmul.mubr.bf16.vlgmr.msra.gmra.mrb[8].mxu1 %v2653_v1 }
 0xf7d   : > { %v2647_v3 = vpop.f32.mrb[4].mxu1 }
 0xf7e   : > { %v2670_v60 = vpack.c.bf16 %v2647_v3, %v2647_v3  ;;  %v3590_v5 = vpop.f32.mrb[5].mxu1 }
 0xf7f   : > { %v2650_v6 = vpop.f32.mrb[6].mxu1 }
 0xf80   : > { %v3591_v61 = vpop.f32.mrb[7].mxu1  ;;  %3609 = vmatmul.mubr.bf16.vlgmr.msra.gmra.mrb[0].mxu0 %v2670_v60 }
 0xf81   : > { %3633 = vmatpush3.bf16.msra.mxu0 %v3911_v4  ;;  %3648 = vmatprep.mubr.msk.bf16.mxu0 %vm4022_vm3, %v4021_v43 }
 0xf82   : > { %3634 = vmatprep.subr.bf16.mxu0 %v4021_v43 }
 0xf85   : > { %3635 = vmatpush3.bf16.msra.mxu0 %v3912_v8 }
 0xf86   : > { %3636 = vmatprep.subr.bf16.mxu0 %v4021_v43 }
 0xf89   : > { %3637 = vmatpush3.bf16.msra.mxu0 %v3913_v33 }
 0xf8a   : > { %3638 = vmatprep.subr.bf16.mxu0 %v4021_v43 }
 0xf8d   : > { %3639 = vmatpush3.bf16.msra.mxu0 %v3914_v9 }
 0xf8e   : > { %3640 = vmatprep.subr.bf16.mxu0 %v4021_v43 }
 0xf91   : > { %3641 = vmatpush3.bf16.msra.mxu0 %v3915_v12 }
 0xf92   : > { %3642 = vmatprep.subr.bf16.mxu0 %v4021_v43 }
 0xf95   : > { %3643 = vmatpush3.bf16.msra.mxu0 %v3916_v13 }
 0xf96   : > { %3644 = vmatprep.subr.bf16.mxu0 %v4021_v43 }
 0xf99   : > { %3645 = vmatpush3.bf16.msra.mxu0 %v3917_v19 }
 0xf9a   : > { %3646 = vmatprep.subr.bf16.mxu0 %v4021_v43 }
 0xf9d   : > { %3647 = vmatpush3.bf16.msra.mxu0 %v3918_v14 }
0x104b   : > { %v2857_v15 = vpop.f32.mrb[8].mxu1 }
0x104c   : > { %v3630_v16 = vpop.f32.mrb[9].mxu1 }
0x104d   : > { %v2860_v17 = vpop.f32.mrb[10].mxu1 }
0x104e   : > { %v3631_v21 = vpop.f32.mrb[11].mxu1 }
0x1053   : > { %v2769_v22 = vpop.f32.mrb[0].mxu0 }
0x1054   : > { %v2858_v24 = vadd.f32 %v2857_v15, %v2769_v22  ;;  %v3610_v25 = vpop.f32.mrb[1].mxu0 }
0x1055   : > { %v2772_v26 = vpop.f32.mrb[2].mxu0 }
0x1056   : > { %v2870_v27 = vadd.f32 %v3346_v23, %v2858_v24  ;;  %v3611_v28 = vpop.f32.mrb[3].mxu0 }
0x1058   : > { %v2871_v29 = vpack.c.bf16 %v2870_v27, %v2870_v27 }
0x105a   : > { %3649 = vmatmul.mubr.bf16.vlgmr.msra.gmra.mrb[4].mxu0 %v2871_v29 }
0x112d   : > { %v2977_v31 = vpop.f32.mrb[4].mxu0 }
0x112e   : > { %v2978_v32 = vadd.f32 %v3347_v30, %v2977_v31  ;;  %v3650_v34 = vpop.f32.mrb[5].mxu0 }
0x112f   : > { %v2980_v35 = vpop.f32.mrb[6].mxu0 }
0x1130   : > { %2983 = vst [vmem:[%s732_s18] sm:$0xff] %v2978_v32  ;;  %v3651_v36 = vpop.f32.mrb[7].mxu0 }
0x1131 PF: > { %s4816_s13 = sld [smem:[#allocation10_spill]]  ;;  %s4817_s1 = sld [smem:[#allocation7_spill]] }
0x1132   : > { %s4819_s21 = sld [smem:[#allocation28_spill]]  ;;  %s2998_s15 = sshll.u32 %s732_s18, 4  ;;  %s2999_s15 = int_to_ptr.vmem [resolvable:$true] %s2998_s15 }
0x1133   : > { %s3919_s25 = scalar_lea.vmem %s2999_s15, 128  ;;  %s4023_s24 = smov [#allocation3]  }
0x1134   : > { %p3920_p2 = scmp.ne.s32.totalorder %s2999_s15, %s3919_s25  ;;  %s3923_s0 = sshll.u32 %s4023_s24, 4  ;;  %s3924_s0 = int_to_ptr.vmem [resolvable:$false] %s3923_s0 }
0x1135   : > { %s3925_s27 = scalar_lea.vmem %s3924_s0, 256  ;;  %p3926_p6 = scmp.lt.s32.totalorder %s2999_s15, %s3924_s0 }
0x1136   : > { %p3921_p4 = pnand %p3920_p2, %p4168_p3  ;;  %p3927_p7 = scmp.lt.s32.totalorder %s3925_s27, %s3919_s25 }
0x1137   : > { %s3357_s16 = sshll.u32 %s4816_s13, 7  ;;  %s4820_s3 = sand.u32 1, %s4817_s1  }
0x1138   : > { %s4685_s29 = scalar_lea.hbm %s4819_s21, %s3357_s16  ;;  %s2985_s22 = scalar_lea.sflag [#allocation4], %s4820_s3 }
0x1139   : > { %p3922_p5 = pneg %p3921_p4  ;;  %p3928_p8 = por %p3927_p7, %p3926_p6 }
0x113b   : > { %p3929_p10 = pnand %p3928_p8, %p3922_p5 }
0x113d   : > { %3932 = shalt.err (!%p3929_p10)
}
0x113e   : > { %s3933_s18 = scalar_lea.hbm %s4685_s29, 128  ;;  %s3937_s14 = scalar_lea.hbm %s4819_s21, 256 }
0x113f   : > { %p3934_p11 = scmp.ne.s32.totalorder %s4685_s29, %s3933_s18  ;;  %p3938_p0 = scmp.lt.u32.totalorder %s4685_s29, %s4819_s21 }
0x1140   : > { %p3939_p1 = scmp.lt.u32.totalorder %s3937_s14, %s3933_s18  ;;  %p3941_p4 = scmp.lt.u32.totalorder %s3933_s18, %s4685_s29 }
0x1141   : > { %p3935_p12 = pnand %p3934_p11, %p4168_p3 }
0x1142   : > { %p3940_p2 = por %p3939_p1, %p3938_p0 }
0x1143   : > { %p3936_p13 = pneg %p3935_p12 }
0x1144   : > { %p3942_p5 = por %p3941_p4, %p3940_p2 }
0x1146   : > { %p3943_p6 = pnand %p3942_p5, %p3936_p13 }
0x1148   : > { %3946 = shalt.err (!%p3943_p6)
}
0x1149   : > { %3654 = dma.vmem_to_hbm [thread:$0]  (%p4168_p3), %s2999_s15, 128, %s4685_s29, %s2985_s22  }
0x114a PF: > { %s4821_s16 = sld [smem:[#allocation13_spill]]  ;;  %s4822_s20 = sld [smem:[#allocation6_spill]] }
0x1150   : > { %p3660_p7 = scmp.ge.s32.totalorder %s4821_s16, 2  ;;  %s3010_s3 = sand.u32 1, %s4822_s20  }
0x1151   : > { %s3011_s25 = scalar_lea.sflag [#allocation4], %s3010_s3 }
0x1152   : > { %p3657_p8 = pnand %p3660_p7, %p4178_p9 }
0x1154   : > { %3980 = dma.done.wait (!%p3657_p8), %s3011_s25, 128  }
0x1155   : > { %3982 = vsyncadd (!%p3657_p8), %s3011_s25, 4294967168  ;;  %s31_s20 = sadd.s32 1, %s4821_s16   ;;  %s4824_s27 = sld [smem:[#allocation7_spill]] }
0x1156   : > { %p28_p10 = scmp.ge.s32.totalorder %s31_s20, 6   ;;  %s4825_s28 = sld [smem:[#allocation8_spill]] }
0x1157   : > { %s4826_s29 = sld [smem:[#allocation18_spill]]  ;;  %s4827_s30 = sld [smem:[#allocation11_spill]] }
0x1158   : > { %s4828_s0 = sld [smem:[#allocation12_spill]]  ;;  %s4829_s19 = sld [smem:[#allocation14_spill]] }
0x1159   : > { %s4830_s1 = sld [smem:[#allocation16_spill]]  ;;  %30 = sbr.rel (!%p28_p10) target bundleno = 16 (0x10), region = 171 }
0x1160   :  { %3016 = vsyncpa [#allocation4], 1 }
0x1161   :  { %3018 = vsyncpa [#allocation4 + $0x1], 1 }

</bundles_post_ra>
